<compile_context>
chip_gen: v5e
topology: v5e:2x2
jax: 0.10.0
libtpu: 0.0.40
codegen_flags: <defaults>
</compile_context>

<pallas_src>
import functools

import jax
import jax.numpy as jnp
from jax.experimental import pallas as pl
from jax.experimental.pallas import tpu as pltpu

KSIZE = 11
PAD = KSIZE // 2          # 5
H1_EXT = 16               # h1 covers [tile_start-16, tile_end+16)  (8-aligned halo)
H2_EXT = 8                # h2 covers [tile_start-8,  tile_end+8)
HP = 24                   # input zero-pad per side; >= H1_EXT + PAD = 21, rounded to 24
L1_OFF = HP - H1_EXT - PAD      # 3: padded-input row offset of tap k=0 for h1 row 0
L2_OFF = H1_EXT - H2_EXT - PAD  # 3: h1 row offset of tap k=0 for h2 row 0
L3_OFF = H2_EXT - PAD           # 3: h2 row offset of tap k=0 for out row 0
NEG_SLOPE = 0.1


def _round_up(x, m):
    return ((x + m - 1) // m) * m


def _fused_kernel(x_ref, w1_ref, b1_ref, w2_ref, b2_ref, w3_ref, b3_ref,
                  o_ref, h1_ref, h2_ref, *, seq_len):
    """One (batch, L-tile) grid step of the fused 3-layer conv stack.

    x_ref : (l_pad + 2*HP, Cin)   whole zero-padded sequence of this batch (VMEM)
    o_ref : (tl, C3)              output tile
    h1_ref: (tl + 32, C1) f32     layer-1 activations (scratch)
    h2_ref: (tl + 16, C2) f32     layer-2 activations (scratch)
    """
    i = pl.program_id(1)
    tl = o_ref.shape[0]
    h1_rows = h1_ref.shape[0]
    h2_rows = h2_ref.shape[0]
    base = pl.multiple_of(i * tl, 8)

    def conv_leaky(slab, w_ref, b_ref):
        # One im2col matmul per layer (contraction depth K*Cin), f32 accumulate.
        lhs = slab if slab.dtype == w_ref.dtype else slab.astype(w_ref.dtype)
        y = jnp.dot(lhs, w_ref[...], preferred_element_type=jnp.float32)
        y = y + b_ref[...]
        return jnp.maximum(y, NEG_SLOPE * y)          # LeakyReLU(0.1), 1 VPU op

    # ---- layer 1: shifted sublane-offset loads straight from the input block.
    slab1 = jnp.concatenate(
        [x_ref[pl.ds(base + L1_OFF + k, h1_rows), :].astype(jnp.float32)
         for k in range(KSIZE)], axis=1)
    h1_ref[...] = conv_leaky(slab1, w1_ref, b1_ref)

    # Rows outside the true sequence must be exact zeros (the reference pads each
    # layer with zeros, not leaky(bias)).  Only edge tiles can have such rows.
    needs_mask = jnp.logical_or(i * tl < H1_EXT, i * tl + tl + H1_EXT > seq_len)

    @pl.when(needs_mask)
    def _():
        p1 = jax.lax.broadcasted_iota(jnp.int32, (h1_rows, 1), 0) + (i * tl - H1_EXT)
        h1_ref[...] = jnp.where((p1 >= 0) & (p1 < seq_len), h1_ref[...], 0.0)

    # ---- layer 2: static shifted loads from the h1 scratch ref.
    slab2 = jnp.concatenate(
        [h1_ref[pl.ds(L2_OFF + k, h2_rows), :] for k in range(KSIZE)], axis=1)
    h2_ref[...] = conv_leaky(slab2, w2_ref, b2_ref)

    @pl.when(needs_mask)
    def _():
        p2 = jax.lax.broadcasted_iota(jnp.int32, (h2_rows, 1), 0) + (i * tl - H2_EXT)
        h2_ref[...] = jnp.where((p2 >= 0) & (p2 < seq_len), h2_ref[...], 0.0)

    # ---- layer 3.
    slab3 = jnp.concatenate(
        [h2_ref[pl.ds(L3_OFF + k, tl), :] for k in range(KSIZE)], axis=1)
    o_ref[...] = conv_leaky(slab3, w3_ref, b3_ref).astype(o_ref.dtype)


def fully_conv_forward(x, params, *, tile_l=512, matmul_dtype=None):
    """Fused FullyConv forward.

    x:            (B, L, input_dim) channels-last (same layout as the module input)
    params:       output of prepare_params(): three (w_im2col (K*Cin, Cout), bias (1, Cout))
    matmul_dtype: optional MXU operand dtype (e.g. jnp.bfloat16 on v6e/v7x);
                  elementwise math / biases / scratch stay f32.
    returns (B, L, output_dim)
    """
    B, L, Cin = x.shape
    (w1, b1), (w2, b2), (w3, b3) = params
    C1, C2, C3 = w1.shape[1], w2.shape[1], w3.shape[1]

    if matmul_dtype is not None:
        w1, w2, w3 = (w.astype(matmul_dtype) for w in (w1, w2, w3))

    tl = min(_round_up(tile_l, 8), _round_up(L, 8))      # sequence tile (8-aligned)
    l_pad = _round_up(L, tl)
    n_tiles = l_pad // tl
    lpp = l_pad + 2 * HP                                 # padded row length

    # One-time zero pad: HP rows each side + tail rows up to a tile multiple.
    xp = jnp.pad(x, ((0, 0), (HP, HP + (l_pad - L)), (0, 0)))

    out = pl.pallas_call(
        functools.partial(_fused_kernel, seq_len=L),
        out_shape=jax.ShapeDtypeStruct((B, l_pad, C3), x.dtype),
        grid_spec=pltpu.PrefetchScalarGridSpec(
            num_scalar_prefetch=0,
            grid=(B, n_tiles),
            in_specs=[
                # Whole padded row per batch; auto-pipelined, fetched once per b,
                # halo windows sliced in-kernel with pl.ds (no manual DMA).
                pl.BlockSpec((None, lpp, Cin), lambda b, i: (b, 0, 0)),
                pl.BlockSpec((KSIZE * Cin, C1), lambda b, i: (0, 0)),
                pl.BlockSpec((1, C1), lambda b, i: (0, 0)),
                pl.BlockSpec((KSIZE * C1, C2), lambda b, i: (0, 0)),
                pl.BlockSpec((1, C2), lambda b, i: (0, 0)),
                pl.BlockSpec((KSIZE * C2, C3), lambda b, i: (0, 0)),
                pl.BlockSpec((1, C3), lambda b, i: (0, 0)),
            ],
            out_specs=pl.BlockSpec((None, tl, C3), lambda b, i: (b, i, 0)),
            scratch_shapes=[
                pltpu.VMEM((tl + 2 * H1_EXT, C1), jnp.float32),   # h1
                pltpu.VMEM((tl + 2 * H2_EXT, C2), jnp.float32),   # h2
            ],
        ),
        compiler_params=pltpu.CompilerParams(
            dimension_semantics=("parallel", "parallel"),
            vmem_limit_bytes=48 * 1024 * 1024,
        ),
    )(xp, w1, b1, w2, b2, w3, b3)
    return out[:, :L, :]


def prepare_params(torch_params):
    """Hoist weight layout prep out of the forward: (Cout, Cin, K) -> (K*Cin, Cout)."""
    prepped = []
    for w_oik, bias in torch_params:
        cout, cin, k = w_oik.shape
        w_im2col = jnp.transpose(w_oik, (2, 1, 0)).reshape(k * cin, cout)
        prepped.append((w_im2col, bias.reshape(1, cout)))
    return prepped


def init_params(key, input_dim, hidden_dim, output_dim):
    """Deterministic PyTorch-style uniform init for the three Conv1d layers."""
    dims = [(input_dim, hidden_dim), (hidden_dim, hidden_dim), (hidden_dim, output_dim)]
    params = []
    for i, (cin, cout) in enumerate(dims):
        kw, kb = jax.random.split(jax.random.fold_in(key, i))
        bound = 1.0 / jnp.sqrt(cin * KSIZE)
        w = jax.random.uniform(kw, (cout, cin, KSIZE), jnp.float32, -bound, bound)
        b = jax.random.uniform(kb, (cout,), jnp.float32, -bound, bound)
        params.append((w, b))
    return params


def ref_forward(x, torch_params):
    """Pure-JAX reference matching the PyTorch forward (NCL conv path)."""
    h = jnp.transpose(x, (0, 2, 1))                      # (B, Cin, L)
    for w_oik, b in torch_params:
        h = jax.lax.conv_general_dilated(
            h, w_oik, window_strides=(1,), padding=[(PAD, PAD)],
            dimension_numbers=("NCH", "OIH", "NCH"))
        h = h + b[None, :, None]
        h = jnp.where(h > 0, h, NEG_SLOPE * h)
    return jnp.transpose(h, (0, 2, 1))                   # (B, L, Cout)


if __name__ == "__main__":
    key = jax.random.PRNGKey(0)

    B, L = 2, 16
    input_dim, hidden_dim, output_dim = 4, 32, 8
    kx, kp = jax.random.split(key)
    x = jax.random.normal(kx, (B, L, input_dim), jnp.float32)
    torch_params = init_params(kp, input_dim, hidden_dim, output_dim)
    params = prepare_params(torch_params)

    out = jax.block_until_ready(fully_conv_forward(x, params))
    assert out.shape == (B, L, output_dim), out.shape
    ref = jax.block_until_ready(ref_forward(x, torch_params))
    assert jnp.allclose(out, ref, atol=1e-4, rtol=1e-4), "mismatch vs reference"

    # Multi-tile / ragged-length check (exercises halo slicing, edge masking, tail pad).
    L2 = 70
    x2 = jax.random.normal(jax.random.fold_in(key, 7), (B, L2, input_dim), jnp.float32)
    out2 = jax.block_until_ready(fully_conv_forward(x2, params, tile_l=32))
    ref2 = ref_forward(x2, torch_params)
    assert out2.shape == (B, L2, output_dim), out2.shape
    assert jnp.allclose(out2, ref2, atol=1e-4, rtol=1e-4), "mismatch vs reference (tiled)"

    # bf16 MXU-operand path (v6e/v7x option); elementwise stays f32, loose parity check.
    out3 = jax.block_until_ready(
        fully_conv_forward(x2, params, tile_l=32, matmul_dtype=jnp.bfloat16))
    assert out3.shape == (B, L2, output_dim), out3.shape
    assert jnp.allclose(out3, ref2, atol=1e-1, rtol=1e-1), "mismatch vs reference (bf16)"

    print("KERNEL_OK")
</pallas_src>

<mosaic_0001>
module attributes {stable_mosaic.version = 11 : i64} {
  func.func @_fused_kernel(%arg0: i32, %arg1: i32, %arg2: memref<1x64x4xf32, #tpu.memory_space<vmem>>, %arg3: memref<44x32xf32, #tpu.memory_space<vmem>>, %arg4: memref<1x32xf32, #tpu.memory_space<vmem>>, %arg5: memref<352x32xf32, #tpu.memory_space<vmem>>, %arg6: memref<1x32xf32, #tpu.memory_space<vmem>>, %arg7: memref<352x8xf32, #tpu.memory_space<vmem>>, %arg8: memref<1x8xf32, #tpu.memory_space<vmem>>, %arg9: memref<1x16x8xf32, #tpu.memory_space<vmem>>, %arg10: memref<48x32xf32, #tpu.memory_space<vmem>>, %arg11: memref<32x32xf32, #tpu.memory_space<vmem>>) attributes {dimension_semantics = [#tpu.dimension_semantics<parallel>, #tpu.dimension_semantics<parallel>], iteration_bounds = array<i64: 2, 1>, scalar_prefetch = 0 : i64, scratch_operands = 2 : i64, tpu.core_type = #tpu.core_type<tc>, window_params = [{transform_indices = @transform_0, window_bounds = array<i64: 1, 64, 4>}, {pipeline_mode = #tpu.pipeline_mode<synchronous>, transform_indices = @transform_1, window_bounds = array<i64: 44, 32>}, {pipeline_mode = #tpu.pipeline_mode<synchronous>, transform_indices = @transform_2, window_bounds = array<i64: 1, 32>}, {pipeline_mode = #tpu.pipeline_mode<synchronous>, transform_indices = @transform_3, window_bounds = array<i64: 352, 32>}, {pipeline_mode = #tpu.pipeline_mode<synchronous>, transform_indices = @transform_4, window_bounds = array<i64: 1, 32>}, {pipeline_mode = #tpu.pipeline_mode<synchronous>, transform_indices = @transform_5, window_bounds = array<i64: 352, 8>}, {pipeline_mode = #tpu.pipeline_mode<synchronous>, transform_indices = @transform_6, window_bounds = array<i64: 1, 8>}, {transform_indices = @transform_7, window_bounds = array<i64: 1, 16, 8>}]} {
    %c16_i32 = arith.constant 16 : i32
    %0 = arith.muli %arg1, %c16_i32 : i32
    %1 = tpu.assume_multiple %0, 8 : i32
    %c3_i32 = arith.constant 3 : i32
    %2 = arith.addi %1, %c3_i32 : i32
    %c0_i32 = arith.constant 0 : i32
    %3 = arith.addi %2, %c0_i32 : i32
    %c0 = arith.constant 0 : index
    %4 = arith.index_cast %3 : i32 to index
    %c0_0 = arith.constant 0 : index
    %5 = vector.load %arg2[%c0, %4, %c0_0] : memref<1x64x4xf32, #tpu.memory_space<vmem>>, vector<1x48x4xf32>
    %6 = vector.shape_cast %5 : vector<1x48x4xf32> to vector<48x4xf32>
    %c3_i32_1 = arith.constant 3 : i32
    %7 = arith.addi %1, %c3_i32_1 : i32
    %c1_i32 = arith.constant 1 : i32
    %8 = arith.addi %7, %c1_i32 : i32
    %c0_2 = arith.constant 0 : index
    %9 = arith.index_cast %8 : i32 to index
    %c0_3 = arith.constant 0 : index
    %10 = vector.load %arg2[%c0_2, %9, %c0_3] : memref<1x64x4xf32, #tpu.memory_space<vmem>>, vector<1x48x4xf32>
    %11 = vector.shape_cast %10 : vector<1x48x4xf32> to vector<48x4xf32>
    %c3_i32_4 = arith.constant 3 : i32
    %12 = arith.addi %1, %c3_i32_4 : i32
    %c2_i32 = arith.constant 2 : i32
    %13 = arith.addi %12, %c2_i32 : i32
    %c0_5 = arith.constant 0 : index
    %14 = arith.index_cast %13 : i32 to index
    %c0_6 = arith.constant 0 : index
    %15 = vector.load %arg2[%c0_5, %14, %c0_6] : memref<1x64x4xf32, #tpu.memory_space<vmem>>, vector<1x48x4xf32>
    %16 = vector.shape_cast %15 : vector<1x48x4xf32> to vector<48x4xf32>
    %c3_i32_7 = arith.constant 3 : i32
    %17 = arith.addi %1, %c3_i32_7 : i32
    %c3_i32_8 = arith.constant 3 : i32
    %18 = arith.addi %17, %c3_i32_8 : i32
    %c0_9 = arith.constant 0 : index
    %19 = arith.index_cast %18 : i32 to index
    %c0_10 = arith.constant 0 : index
    %20 = vector.load %arg2[%c0_9, %19, %c0_10] : memref<1x64x4xf32, #tpu.memory_space<vmem>>, vector<1x48x4xf32>
    %21 = vector.shape_cast %20 : vector<1x48x4xf32> to vector<48x4xf32>
    %c3_i32_11 = arith.constant 3 : i32
    %22 = arith.addi %1, %c3_i32_11 : i32
    %c4_i32 = arith.constant 4 : i32
    %23 = arith.addi %22, %c4_i32 : i32
    %c0_12 = arith.constant 0 : index
    %24 = arith.index_cast %23 : i32 to index
    %c0_13 = arith.constant 0 : index
    %25 = vector.load %arg2[%c0_12, %24, %c0_13] : memref<1x64x4xf32, #tpu.memory_space<vmem>>, vector<1x48x4xf32>
    %26 = vector.shape_cast %25 : vector<1x48x4xf32> to vector<48x4xf32>
    %c3_i32_14 = arith.constant 3 : i32
    %27 = arith.addi %1, %c3_i32_14 : i32
    %c5_i32 = arith.constant 5 : i32
    %28 = arith.addi %27, %c5_i32 : i32
    %c0_15 = arith.constant 0 : index
    %29 = arith.index_cast %28 : i32 to index
    %c0_16 = arith.constant 0 : index
    %30 = vector.load %arg2[%c0_15, %29, %c0_16] : memref<1x64x4xf32, #tpu.memory_space<vmem>>, vector<1x48x4xf32>
    %31 = vector.shape_cast %30 : vector<1x48x4xf32> to vector<48x4xf32>
    %c3_i32_17 = arith.constant 3 : i32
    %32 = arith.addi %1, %c3_i32_17 : i32
    %c6_i32 = arith.constant 6 : i32
    %33 = arith.addi %32, %c6_i32 : i32
    %c0_18 = arith.constant 0 : index
    %34 = arith.index_cast %33 : i32 to index
    %c0_19 = arith.constant 0 : index
    %35 = vector.load %arg2[%c0_18, %34, %c0_19] : memref<1x64x4xf32, #tpu.memory_space<vmem>>, vector<1x48x4xf32>
    %36 = vector.shape_cast %35 : vector<1x48x4xf32> to vector<48x4xf32>
    %c3_i32_20 = arith.constant 3 : i32
    %37 = arith.addi %1, %c3_i32_20 : i32
    %c7_i32 = arith.constant 7 : i32
    %38 = arith.addi %37, %c7_i32 : i32
    %c0_21 = arith.constant 0 : index
    %39 = arith.index_cast %38 : i32 to index
    %c0_22 = arith.constant 0 : index
    %40 = vector.load %arg2[%c0_21, %39, %c0_22] : memref<1x64x4xf32, #tpu.memory_space<vmem>>, vector<1x48x4xf32>
    %41 = vector.shape_cast %40 : vector<1x48x4xf32> to vector<48x4xf32>
    %c3_i32_23 = arith.constant 3 : i32
    %42 = arith.addi %1, %c3_i32_23 : i32
    %c8_i32 = arith.constant 8 : i32
    %43 = arith.addi %42, %c8_i32 : i32
    %c0_24 = arith.constant 0 : index
    %44 = arith.index_cast %43 : i32 to index
    %c0_25 = arith.constant 0 : index
    %45 = vector.load %arg2[%c0_24, %44, %c0_25] : memref<1x64x4xf32, #tpu.memory_space<vmem>>, vector<1x48x4xf32>
    %46 = vector.shape_cast %45 : vector<1x48x4xf32> to vector<48x4xf32>
    %c3_i32_26 = arith.constant 3 : i32
    %47 = arith.addi %1, %c3_i32_26 : i32
    %c9_i32 = arith.constant 9 : i32
    %48 = arith.addi %47, %c9_i32 : i32
    %c0_27 = arith.constant 0 : index
    %49 = arith.index_cast %48 : i32 to index
    %c0_28 = arith.constant 0 : index
    %50 = vector.load %arg2[%c0_27, %49, %c0_28] : memref<1x64x4xf32, #tpu.memory_space<vmem>>, vector<1x48x4xf32>
    %51 = vector.shape_cast %50 : vector<1x48x4xf32> to vector<48x4xf32>
    %c3_i32_29 = arith.constant 3 : i32
    %52 = arith.addi %1, %c3_i32_29 : i32
    %c10_i32 = arith.constant 10 : i32
    %53 = arith.addi %52, %c10_i32 : i32
    %c0_30 = arith.constant 0 : index
    %54 = arith.index_cast %53 : i32 to index
    %c0_31 = arith.constant 0 : index
    %55 = vector.load %arg2[%c0_30, %54, %c0_31] : memref<1x64x4xf32, #tpu.memory_space<vmem>>, vector<1x48x4xf32>
    %56 = vector.shape_cast %55 : vector<1x48x4xf32> to vector<48x4xf32>
    %57 = tpu.concatenate %6, %11, %16, %21, %26, %31, %36, %41, %46, %51, %56 in 1 : vector<48x4xf32>, vector<48x4xf32>, vector<48x4xf32>, vector<48x4xf32>, vector<48x4xf32>, vector<48x4xf32>, vector<48x4xf32>, vector<48x4xf32>, vector<48x4xf32>, vector<48x4xf32>, vector<48x4xf32> -> vector<48x44xf32>
    %c0_32 = arith.constant 0 : index
    %c0_33 = arith.constant 0 : index
    %58 = vector.load %arg3[%c0_32, %c0_33] : memref<44x32xf32, #tpu.memory_space<vmem>>, vector<44x32xf32>
    %cst = arith.constant dense<0.000000e+00> : vector<48x32xf32>
    %59 = tpu.matmul %57, %58, %cst {dimension_numbers = #tpu.dot_dimension_numbers<[1], [0], [0], [1], [0, 0, 1, 1], [], []>} : vector<48x44xf32>, vector<44x32xf32>, vector<48x32xf32> -> vector<48x32xf32>
    %c0_34 = arith.constant 0 : index
    %c0_35 = arith.constant 0 : index
    %60 = vector.load %arg4[%c0_34, %c0_35] : memref<1x32xf32, #tpu.memory_space<vmem>>, vector<1x32xf32>
    %61 = vector.broadcast %60 : vector<1x32xf32> to vector<48x32xf32>
    %62 = arith.addf %59, %61 : vector<48x32xf32>
    %cst_36 = arith.constant 1.000000e-01 : f32
    %63 = vector.broadcast %cst_36 : f32 to vector<48x32xf32>
    %64 = arith.mulf %63, %62 : vector<48x32xf32>
    %65 = arith.maximumf %62, %64 : vector<48x32xf32>
    %c0_37 = arith.constant 0 : index
    %c0_38 = arith.constant 0 : index
    %66 = vector.load %arg10[%c0_37, %c0_38] : memref<48x32xf32, #tpu.memory_space<vmem>>, vector<48x32xf32>
    tpu.vector_store %arg10[%c0_37, %c0_38], %65 {strides = array<i32>} : memref<48x32xf32, #tpu.memory_space<vmem>>, vector<48x32xf32>,
    %c16_i32_39 = arith.constant 16 : i32
    %67 = arith.muli %arg1, %c16_i32_39 : i32
    %c16_i32_40 = arith.constant 16 : i32
    %68 = arith.cmpi slt, %67, %c16_i32_40 : i32
    %c16_i32_41 = arith.constant 16 : i32
    %69 = arith.muli %arg1, %c16_i32_41 : i32
    %c16_i32_42 = arith.constant 16 : i32
    %70 = arith.addi %69, %c16_i32_42 : i32
    %c16_i32_43 = arith.constant 16 : i32
    %71 = arith.addi %70, %c16_i32_43 : i32
    %c16_i32_44 = arith.constant 16 : i32
    %72 = arith.cmpi sgt, %71, %c16_i32_44 : i32
    %73 = arith.ori %68, %72 : i1
    %74 = arith.extui %73 : i1 to i32
    %c0_i32_45 = arith.constant 0 : i32
    %75 = arith.cmpi ne, %74, %c0_i32_45 : i32
    scf.if %75 {
      %122 = tpu.iota {dimensions = array<i32: 0>} : vector<48x1xi32>
      %c16_i32_97 = arith.constant 16 : i32
      %123 = arith.muli %arg1, %c16_i32_97 : i32
      %c16_i32_98 = arith.constant 16 : i32
      %124 = arith.subi %123, %c16_i32_98 : i32
      %125 = vector.broadcast %124 : i32 to vector<48x1xi32>
      %126 = arith.addi %122, %125 : vector<48x1xi32>
      %c0_i32_99 = arith.constant 0 : i32
      %127 = vector.broadcast %c0_i32_99 : i32 to vector<48x1xi32>
      %128 = arith.cmpi sge, %126, %127 : vector<48x1xi32>
      %c16_i32_100 = arith.constant 16 : i32
      %129 = vector.broadcast %c16_i32_100 : i32 to vector<48x1xi32>
      %130 = arith.cmpi slt, %126, %129 : vector<48x1xi32>
      %131 = arith.andi %128, %130 : vector<48x1xi1>
      %c0_101 = arith.constant 0 : index
      %c0_102 = arith.constant 0 : index
      %132 = vector.load %arg10[%c0_101, %c0_102] : memref<48x32xf32, #tpu.memory_space<vmem>>, vector<48x32xf32>
      %cst_103 = arith.constant 0.000000e+00 : f32
      %133 = vector.shape_cast %131 : vector<48x1xi1> to vector<48x1xi1>
      %134 = vector.broadcast %133 : vector<48x1xi1> to vector<48x32xi1>
      %135 = vector.broadcast %cst_103 : f32 to vector<48x32xf32>
      %136 = arith.select %134, %132, %135 : vector<48x32xi1>, vector<48x32xf32>
      %c0_104 = arith.constant 0 : index
      %c0_105 = arith.constant 0 : index
      %137 = vector.load %arg10[%c0_104, %c0_105] : memref<48x32xf32, #tpu.memory_space<vmem>>, vector<48x32xf32>
      tpu.vector_store %arg10[%c0_104, %c0_105], %136 {strides = array<i32>} : memref<48x32xf32, #tpu.memory_space<vmem>>, vector<48x32xf32>,
    } else {
    }
    %c3 = arith.constant 3 : index
    %c0_46 = arith.constant 0 : index
    %76 = vector.load %arg10[%c3, %c0_46] : memref<48x32xf32, #tpu.memory_space<vmem>>, vector<32x32xf32>
    %c4 = arith.constant 4 : index
    %c0_47 = arith.constant 0 : index
    %77 = vector.load %arg10[%c4, %c0_47] : memref<48x32xf32, #tpu.memory_space<vmem>>, vector<32x32xf32>
    %c5 = arith.constant 5 : index
    %c0_48 = arith.constant 0 : index
    %78 = vector.load %arg10[%c5, %c0_48] : memref<48x32xf32, #tpu.memory_space<vmem>>, vector<32x32xf32>
    %c6 = arith.constant 6 : index
    %c0_49 = arith.constant 0 : index
    %79 = vector.load %arg10[%c6, %c0_49] : memref<48x32xf32, #tpu.memory_space<vmem>>, vector<32x32xf32>
    %c7 = arith.constant 7 : index
    %c0_50 = arith.constant 0 : index
    %80 = vector.load %arg10[%c7, %c0_50] : memref<48x32xf32, #tpu.memory_space<vmem>>, vector<32x32xf32>
    %c8 = arith.constant 8 : index
    %c0_51 = arith.constant 0 : index
    %81 = vector.load %arg10[%c8, %c0_51] : memref<48x32xf32, #tpu.memory_space<vmem>>, vector<32x32xf32>
    %c9 = arith.constant 9 : index
    %c0_52 = arith.constant 0 : index
    %82 = vector.load %arg10[%c9, %c0_52] : memref<48x32xf32, #tpu.memory_space<vmem>>, vector<32x32xf32>
    %c10 = arith.constant 10 : index
    %c0_53 = arith.constant 0 : index
    %83 = vector.load %arg10[%c10, %c0_53] : memref<48x32xf32, #tpu.memory_space<vmem>>, vector<32x32xf32>
    %c11 = arith.constant 11 : index
    %c0_54 = arith.constant 0 : index
    %84 = vector.load %arg10[%c11, %c0_54] : memref<48x32xf32, #tpu.memory_space<vmem>>, vector<32x32xf32>
    %c12 = arith.constant 12 : index
    %c0_55 = arith.constant 0 : index
    %85 = vector.load %arg10[%c12, %c0_55] : memref<48x32xf32, #tpu.memory_space<vmem>>, vector<32x32xf32>
    %c13 = arith.constant 13 : index
    %c0_56 = arith.constant 0 : index
    %86 = vector.load %arg10[%c13, %c0_56] : memref<48x32xf32, #tpu.memory_space<vmem>>, vector<32x32xf32>
    %87 = tpu.concatenate %76, %77, %78, %79, %80, %81, %82, %83, %84, %85, %86 in 1 : vector<32x32xf32>, vector<32x32xf32>, vector<32x32xf32>, vector<32x32xf32>, vector<32x32xf32>, vector<32x32xf32>, vector<32x32xf32>, vector<32x32xf32>, vector<32x32xf32>, vector<32x32xf32>, vector<32x32xf32> -> vector<32x352xf32>
    %c0_57 = arith.constant 0 : index
    %c0_58 = arith.constant 0 : index
    %88 = vector.load %arg5[%c0_57, %c0_58] : memref<352x32xf32, #tpu.memory_space<vmem>>, vector<352x32xf32>
    %cst_59 = arith.constant dense<0.000000e+00> : vector<32x32xf32>
    %89 = tpu.matmul %87, %88, %cst_59 {dimension_numbers = #tpu.dot_dimension_numbers<[1], [0], [0], [1], [0, 0, 1, 1], [], []>} : vector<32x352xf32>, vector<352x32xf32>, vector<32x32xf32> -> vector<32x32xf32>
    %c0_60 = arith.constant 0 : index
    %c0_61 = arith.constant 0 : index
    %90 = vector.load %arg6[%c0_60, %c0_61] : memref<1x32xf32, #tpu.memory_space<vmem>>, vector<1x32xf32>
    %91 = vector.broadcast %90 : vector<1x32xf32> to vector<32x32xf32>
    %92 = arith.addf %89, %91 : vector<32x32xf32>
    %cst_62 = arith.constant 1.000000e-01 : f32
    %93 = vector.broadcast %cst_62 : f32 to vector<32x32xf32>
    %94 = arith.mulf %93, %92 : vector<32x32xf32>
    %95 = arith.maximumf %92, %94 : vector<32x32xf32>
    %c0_63 = arith.constant 0 : index
    %c0_64 = arith.constant 0 : index
    %96 = vector.load %arg11[%c0_63, %c0_64] : memref<32x32xf32, #tpu.memory_space<vmem>>, vector<32x32xf32>
    tpu.vector_store %arg11[%c0_63, %c0_64], %95 {strides = array<i32>} : memref<32x32xf32, #tpu.memory_space<vmem>>, vector<32x32xf32>,
    %97 = arith.extui %73 : i1 to i32
    %c0_i32_65 = arith.constant 0 : i32
    %98 = arith.cmpi ne, %97, %c0_i32_65 : i32
    scf.if %98 {
      %122 = tpu.iota {dimensions = array<i32: 0>} : vector<32x1xi32>
      %c16_i32_97 = arith.constant 16 : i32
      %123 = arith.muli %arg1, %c16_i32_97 : i32
      %c8_i32_98 = arith.constant 8 : i32
      %124 = arith.subi %123, %c8_i32_98 : i32
      %125 = vector.broadcast %124 : i32 to vector<32x1xi32>
      %126 = arith.addi %122, %125 : vector<32x1xi32>
      %c0_i32_99 = arith.constant 0 : i32
      %127 = vector.broadcast %c0_i32_99 : i32 to vector<32x1xi32>
      %128 = arith.cmpi sge, %126, %127 : vector<32x1xi32>
      %c16_i32_100 = arith.constant 16 : i32
      %129 = vector.broadcast %c16_i32_100 : i32 to vector<32x1xi32>
      %130 = arith.cmpi slt, %126, %129 : vector<32x1xi32>
      %131 = arith.andi %128, %130 : vector<32x1xi1>
      %c0_101 = arith.constant 0 : index
      %c0_102 = arith.constant 0 : index
      %132 = vector.load %arg11[%c0_101, %c0_102] : memref<32x32xf32, #tpu.memory_space<vmem>>, vector<32x32xf32>
      %cst_103 = arith.constant 0.000000e+00 : f32
      %133 = vector.shape_cast %131 : vector<32x1xi1> to vector<32x1xi1>
      %134 = vector.broadcast %133 : vector<32x1xi1> to vector<32x32xi1>
      %135 = vector.broadcast %cst_103 : f32 to vector<32x32xf32>
      %136 = arith.select %134, %132, %135 : vector<32x32xi1>, vector<32x32xf32>
      %c0_104 = arith.constant 0 : index
      %c0_105 = arith.constant 0 : index
      %137 = vector.load %arg11[%c0_104, %c0_105] : memref<32x32xf32, #tpu.memory_space<vmem>>, vector<32x32xf32>
      tpu.vector_store %arg11[%c0_104, %c0_105], %136 {strides = array<i32>} : memref<32x32xf32, #tpu.memory_space<vmem>>, vector<32x32xf32>,
    } else {
    }
    %c3_66 = arith.constant 3 : index
    %c0_67 = arith.constant 0 : index
    %99 = vector.load %arg11[%c3_66, %c0_67] : memref<32x32xf32, #tpu.memory_space<vmem>>, vector<16x32xf32>
    %c4_68 = arith.constant 4 : index
    %c0_69 = arith.constant 0 : index
    %100 = vector.load %arg11[%c4_68, %c0_69] : memref<32x32xf32, #tpu.memory_space<vmem>>, vector<16x32xf32>
    %c5_70 = arith.constant 5 : index
    %c0_71 = arith.constant 0 : index
    %101 = vector.load %arg11[%c5_70, %c0_71] : memref<32x32xf32, #tpu.memory_space<vmem>>, vector<16x32xf32>
    %c6_72 = arith.constant 6 : index
    %c0_73 = arith.constant 0 : index
    %102 = vector.load %arg11[%c6_72, %c0_73] : memref<32x32xf32, #tpu.memory_space<vmem>>, vector<16x32xf32>
    %c7_74 = arith.constant 7 : index
    %c0_75 = arith.constant 0 : index
    %103 = vector.load %arg11[%c7_74, %c0_75] : memref<32x32xf32, #tpu.memory_space<vmem>>, vector<16x32xf32>
    %c8_76 = arith.constant 8 : index
    %c0_77 = arith.constant 0 : index
    %104 = vector.load %arg11[%c8_76, %c0_77] : memref<32x32xf32, #tpu.memory_space<vmem>>, vector<16x32xf32>
    %c9_78 = arith.constant 9 : index
    %c0_79 = arith.constant 0 : index
    %105 = vector.load %arg11[%c9_78, %c0_79] : memref<32x32xf32, #tpu.memory_space<vmem>>, vector<16x32xf32>
    %c10_80 = arith.constant 10 : index
    %c0_81 = arith.constant 0 : index
    %106 = vector.load %arg11[%c10_80, %c0_81] : memref<32x32xf32, #tpu.memory_space<vmem>>, vector<16x32xf32>
    %c11_82 = arith.constant 11 : index
    %c0_83 = arith.constant 0 : index
    %107 = vector.load %arg11[%c11_82, %c0_83] : memref<32x32xf32, #tpu.memory_space<vmem>>, vector<16x32xf32>
    %c12_84 = arith.constant 12 : index
    %c0_85 = arith.constant 0 : index
    %108 = vector.load %arg11[%c12_84, %c0_85] : memref<32x32xf32, #tpu.memory_space<vmem>>, vector<16x32xf32>
    %c13_86 = arith.constant 13 : index
    %c0_87 = arith.constant 0 : index
    %109 = vector.load %arg11[%c13_86, %c0_87] : memref<32x32xf32, #tpu.memory_space<vmem>>, vector<16x32xf32>
    %110 = tpu.concatenate %99, %100, %101, %102, %103, %104, %105, %106, %107, %108, %109 in 1 : vector<16x32xf32>, vector<16x32xf32>, vector<16x32xf32>, vector<16x32xf32>, vector<16x32xf32>, vector<16x32xf32>, vector<16x32xf32>, vector<16x32xf32>, vector<16x32xf32>, vector<16x32xf32>, vector<16x32xf32> -> vector<16x352xf32>
    %c0_88 = arith.constant 0 : index
    %c0_89 = arith.constant 0 : index
    %111 = vector.load %arg7[%c0_88, %c0_89] : memref<352x8xf32, #tpu.memory_space<vmem>>, vector<352x8xf32>
    %cst_90 = arith.constant dense<0.000000e+00> : vector<16x8xf32>
    %112 = tpu.matmul %110, %111, %cst_90 {dimension_numbers = #tpu.dot_dimension_numbers<[1], [0], [0], [1], [0, 0, 1, 1], [], []>} : vector<16x352xf32>, vector<352x8xf32>, vector<16x8xf32> -> vector<16x8xf32>
    %c0_91 = arith.constant 0 : index
    %c0_92 = arith.constant 0 : index
    %113 = vector.load %arg8[%c0_91, %c0_92] : memref<1x8xf32, #tpu.memory_space<vmem>>, vector<1x8xf32>
    %114 = vector.broadcast %113 : vector<1x8xf32> to vector<16x8xf32>
    %115 = arith.addf %112, %114 : vector<16x8xf32>
    %cst_93 = arith.constant 1.000000e-01 : f32
    %116 = vector.broadcast %cst_93 : f32 to vector<16x8xf32>
    %117 = arith.mulf %116, %115 : vector<16x8xf32>
    %118 = arith.maximumf %115, %117 : vector<16x8xf32>
    %c0_94 = arith.constant 0 : index
    %c0_95 = arith.constant 0 : index
    %c0_96 = arith.constant 0 : index
    %119 = vector.load %arg9[%c0_94, %c0_95, %c0_96] : memref<1x16x8xf32, #tpu.memory_space<vmem>>, vector<1x16x8xf32>
    %120 = vector.shape_cast %119 : vector<1x16x8xf32> to vector<16x8xf32>
    %121 = vector.shape_cast %118 : vector<16x8xf32> to vector<1x16x8xf32>
    tpu.vector_store %arg9[%c0_94, %c0_95, %c0_96], %121 {strides = array<i32>} : memref<1x16x8xf32, #tpu.memory_space<vmem>>, vector<1x16x8xf32>,
    return
  }
  func.func @transform_0(%arg0: i32, %arg1: i32) -> (i32, i32, i32) {
    %c0_i32 = arith.constant 0 : i32
    %c0_i32_0 = arith.constant 0 : i32
    %c0_i32_1 = arith.constant 0 : i32
    return %arg0, %c0_i32, %c0_i32_0 : i32, i32, i32
  }
  func.func @transform_1(%arg0: i32, %arg1: i32) -> (i32, i32) {
    %c0_i32 = arith.constant 0 : i32
    %c0_i32_0 = arith.constant 0 : i32
    %c0_i32_1 = arith.constant 0 : i32
    return %c0_i32, %c0_i32_0 : i32, i32
  }
  func.func @transform_2(%arg0: i32, %arg1: i32) -> (i32, i32) {
    %c0_i32 = arith.constant 0 : i32
    %c0_i32_0 = arith.constant 0 : i32
    %c0_i32_1 = arith.constant 0 : i32
    return %c0_i32, %c0_i32_0 : i32, i32
  }
  func.func @transform_3(%arg0: i32, %arg1: i32) -> (i32, i32) {
    %c0_i32 = arith.constant 0 : i32
    %c0_i32_0 = arith.constant 0 : i32
    %c0_i32_1 = arith.constant 0 : i32
    return %c0_i32, %c0_i32_0 : i32, i32
  }
  func.func @transform_4(%arg0: i32, %arg1: i32) -> (i32, i32) {
    %c0_i32 = arith.constant 0 : i32
    %c0_i32_0 = arith.constant 0 : i32
    %c0_i32_1 = arith.constant 0 : i32
    return %c0_i32, %c0_i32_0 : i32, i32
  }
  func.func @transform_5(%arg0: i32, %arg1: i32) -> (i32, i32) {
    %c0_i32 = arith.constant 0 : i32
    %c0_i32_0 = arith.constant 0 : i32
    %c0_i32_1 = arith.constant 0 : i32
    return %c0_i32, %c0_i32_0 : i32, i32
  }
  func.func @transform_6(%arg0: i32, %arg1: i32) -> (i32, i32) {
    %c0_i32 = arith.constant 0 : i32
    %c0_i32_0 = arith.constant 0 : i32
    %c0_i32_1 = arith.constant 0 : i32
    return %c0_i32, %c0_i32_0 : i32, i32
  }
  func.func @transform_7(%arg0: i32, %arg1: i32) -> (i32, i32, i32) {
    %c0_i32 = arith.constant 0 : i32
    %c0_i32_0 = arith.constant 0 : i32
    return %arg0, %arg1, %c0_i32 : i32, i32, i32
  }
}

</mosaic_0001>

<bundles_post_ra>
// kernel: tpu_custom_call.1
= control target key start
LH: loop header
LB: loop body
LE: loop exit
PB: predicated region body
PF: predicated region fallthrough
CT: control target
= control target key end

     0   :  { %s1832_s24 = smov 0   ;;  %s1834_s25 = smov 0   ;;  %s2474_s0 = inlined_call_operand.vmem [shape: f32[2,64,4], index: 0, kind: input, shape index: {}]   ;;  %s2475_s1 = inlined_call_operand.vmem [shape: f32[44,32], index: 1, kind: input, shape index: {}]   ;;  %s2476_s2 = inlined_call_operand.vmem [shape: f32[1,32], index: 2, kind: input, shape index: {}]   ;;  %s2477_s3 = inlined_call_operand.vmem [shape: f32[352,32], index: 3, kind: input, shape index: {}]   ;;  %s2478_s4 = inlined_call_operand.vmem [shape: f32[1,32], index: 4, kind: input, shape index: {}]   ;;  %s2479_s5 = inlined_call_operand.vmem [shape: f32[352,8], index: 5, kind: input, shape index: {}]   ;;  %s2480_s6 = inlined_call_operand.vmem [shape: f32[1,8], index: 6, kind: input, shape index: {}]   ;;  %s2481_s7 = inlined_call_operand.vmem [shape: f32[2,16,8], index: 7, kind: output, shape index: {}]  }
   0x1   :  { %s1836_s26 = smov 0  }
   0x2 LB: > { %s29_s27 = sadd.s32 1, %s1773_s25  ;;  %p1565_p0 = scmp.ge.s32.totalorder %s1777_s26, 1  ;;  %s1777_s26 = sphi %s1836_s26, %s17_s26   ;;  %s1773_s25 = sphi %s1834_s25, %s2483_s25   ;;  %s1769_s24 = sphi %s1832_s24, %s2482_s24  }
   0x3   : > { %p31_p1 = scmp.ge.s32.totalorder %s29_s27, 2  ;;  %p251_p2 = scmp.lt.s32.totalorder %s1777_s26, 3 }
   0x5   : > { %s2485_s27 = smov (%p31_p1, %s29_s27), 0  ;;  %p252_p3 = pnand %p1565_p0, %p251_p2 }
   0x6   : > { %p287_p4 = scmp.lt.s32.totalorder (!%p252_p3), %s1769_s24, 1  ;;  %s1779_s9 = smov (!%p252_p3), 12  }
   0x7   : > { %255 = sbr.rel (%p252_p3) target bundleno = 965 (0x3c5), region = 48  ;;  %s1780_s10 = smov (!%p252_p3), 4  }
   0x8   : > { %s1781_s11 = smov (!%p252_p3), 20   ;;  %s1782_s12 = smov (!%p252_p3), 16  }
   0x9   : > { %s1783_s13 = smov (!%p252_p3), 8   ;;  %s1784_s14 = smov (!%p252_p3), 24  }
   0xa   : > { %s1785_s15 = smov (!%p252_p3), 32   ;;  %s1786_s16 = smov (!%p252_p3), 28  }
   0xb   : > { %s1787_s17 = smov (!%p252_p3), 36   ;;  %s1788_s18 = smov (!%p252_p3), 40  }
   0xc   : > { %s2487_s24 = smov (!%p287_p4, %s1769_s24), 1  ;;  %v706_v33 = vld [vmem:[%s2475_s1 + $0x28] sm:$0xf]  ;;  %vm730_vm0 = vcmask 1043456   ;;  %v705_v35 = vld [vmem:[%s2475_s1 + $0x20] sm:$0xff]  ;;  %v704_v36 = vld [vmem:[%s2475_s1 + $0x18] sm:$0xff] }
   0xd   : > { %s1651_s28 = sshll.u32 %s2487_s24, 6  ;;  %1636 = vmatpush.msk.msra.mxu0 %vm730_vm0, %v706_v33  ;;  %v703_v39 = vld [vmem:[%s2475_s1 + $0x10] sm:$0xff]  ;;  %v702_v40 = vld [vmem:[%s2475_s1 + $0x8] sm:$0xff]  ;;  %v701_v41 = vld [vmem:[%s2475_s1] sm:$0xff]  ;;  %vm631_vm1 = vcmask 31744   ;;  %vm638_vm2 = vcmask 64512  }
   0xe   : > { %s1856_s8 = scalar_lea.vmem %s2474_s0, %s1651_s28  ;;  %vm645_vm3 = vcmask 97280   ;;  %vm652_vm4 = vcmask 130048   ;;  %vm659_vm5 = vcmask 162816   ;;  %vm666_vm6 = vcmask 195584   ;;  %s1652_s29 = sshll.u32 %s2487_s24, 4 }
   0xf   : > { %v1588_v0 = vld [vmem:[%s1856_s8 + $0x6] sm:$0xff]  ;;  %v1595_v10 = vld [vmem:[%s1856_s8 + $0xf] sm:$0xff]  ;;  %v1596_v19 = vld [vmem:[%s1856_s8 + $0x17] sm:$0xff]  ;;  %745 = vmatpush.msra.mxu0 %v705_v35  ;;  %vm673_vm7 = vcmask 228352   ;;  %vm680_vm8 = vcmask 261120   ;;  %vm687_vm9 = vcmask 293888   ;;  %s300_s20 = scalar_lea.vmem %s2481_s7, %s1652_s29 }
  0x10   : > { %v1576_v1 = vld [vmem:[%s1856_s8 + $0x4] sm:$0xff]  ;;  %445 = vrot.lane.b32.xlu1 %v1588_v0, %s1779_s9  ;;  %v1624_v8 = vld [vmem:[%s1856_s8 + $0xc] sm:$0xff]  ;;  %v1625_v16 = vld [vmem:[%s1856_s8 + $0x14] sm:$0xff]  ;;  %vm694_vm10 = vcmask 326656   ;;  %vm711_vm11 = vcmask 359424   ;;  %vm1000_vm12 = vcmask 523264  }
  0x11   : > { %397 = vrot.lane.b32.xlu0 %v1576_v1, %s1780_s10  ;;  %v1600_v2 = vld [vmem:[%s1856_s8 + $0x8] sm:$0xff]  ;;  %v1601_v12 = vld [vmem:[%s1856_s8 + $0x10] sm:$0xff]  ;;  %v1608_v20 = vld [vmem:[%s1856_s8 + $0x19] sm:$0xff]  ;;  %746 = vmatpush.msra.mxu0 %v704_v36  ;;  %vm1005_vm13 = vcmask 785408  }
  0x12   : > { %493 = vrot.lane.b32.xlu2 %v1600_v2, %s1781_s11  ;;  %v1594_v3 = vld [vmem:[%s1856_s8 + $0x7] sm:$0xff]  ;;  %v1613_v13 = vld [vmem:[%s1856_s8 + $0x12] sm:$0xff]  ;;  %v1614_v22 = vld [vmem:[%s1856_s8 + $0x1a] sm:$0xff] }
  0x13   : > { %v1582_v4 = vld [vmem:[%s1856_s8 + $0x5] sm:$0xff]  ;;  %v1583_v9 = vld [vmem:[%s1856_s8 + $0xd] sm:$0xff]  ;;  %v1631_v17 = vld [vmem:[%s1856_s8 + $0x15] sm:$0xff]  ;;  %747 = vmatpush.msra.mxu0 %v703_v39 }
  0x14   : > { %v1606_v5 = vld [vmem:[%s1856_s8 + $0x9] sm:$0xff]  ;;  %v1607_v14 = vld [vmem:[%s1856_s8 + $0x11] sm:$0xff]  ;;  %v1579_v23 = vld [vmem:[%s1856_s8 + $0x1c] sm:$0xff] }
  0x15   : > { %v1871_v6 = vld [vmem:[%s1856_s8 + $0xb] sm:$0xff]  ;;  %v1894_v15 = vld [vmem:[%s1856_s8 + $0x13] sm:$0xff]  ;;  %v1916_v24 = vld [vmem:[%s1856_s8 + $0x1b] sm:$0xff]  ;;  %748 = vmatpush.msra.mxu0 %v702_v40 }
  0x16   : > { %v1612_v7 = vld [vmem:[%s1856_s8 + $0xa] sm:$0xff]  ;;  %v1590_v18 = vld [vmem:[%s1856_s8 + $0x16] sm:$0xff]  ;;  %v1591_v26 = vld [vmem:[%s1856_s8 + $0x1e] sm:$0xff] }
  0x17   : > { %v1589_v11 = vld [vmem:[%s1856_s8 + $0xe] sm:$0xff]  ;;  %v1602_v21 = vld [vmem:[%s1856_s8 + $0x18] sm:$0xff]  ;;  %v1603_v28 = vld [vmem:[%s1856_s8 + $0x20] sm:$0xff]  ;;  %749 = vmatpush.msra.mxu0 %v701_v41 }
  0x18   : > { %469 = vrot.lane.b32.xlu1 %v1594_v3, %s1782_s12  ;;  %v1632_v25 = vld [vmem:[%s1856_s8 + $0x1d] sm:$0xff]  ;;  %v1633_v37 = vld [vmem:[%s1856_s8 + $0x25] sm:$0xff]  ;;  %v1634_v59 = vld [vmem:[%s1856_s8 + $0x2d] sm:$0xff] }
  0x19   : > { %421 = vrot.lane.b32.xlu0 %v1582_v4, %s1783_s13  ;;  %v1597_v27 = vld [vmem:[%s1856_s8 + $0x1f] sm:$0xff]  ;;  %v1598_v43 = vld [vmem:[%s1856_s8 + $0x27] sm:$0xff] }
  0x1a   : > { %517 = vrot.lane.b32.xlu2 %v1606_v5, %s1784_s14  ;;  %v1609_v29 = vld [vmem:[%s1856_s8 + $0x21] sm:$0xff]  ;;  %v1610_v48 = vld [vmem:[%s1856_s8 + $0x29] sm:$0xff] }
  0x1b   : > { %v1615_v30 = vld [vmem:[%s1856_s8 + $0x22] sm:$0xff]  ;;  %v1616_v49 = vld [vmem:[%s1856_s8 + $0x2a] sm:$0xff] }
  0x1c   : > { %v1935_v31 = vld [vmem:[%s1856_s8 + $0x23] sm:$0xff]  ;;  %v1978_v52 = vld [vmem:[%s1856_s8 + $0x2b] sm:$0xff] }
  0x1d   : > { %v1580_v34 = vld [vmem:[%s1856_s8 + $0x24] sm:$0xff]  ;;  %v1628_v58 = vld [vmem:[%s1856_s8 + $0x2c] sm:$0xff] }
  0x1e   : > { %v1592_v42 = vld [vmem:[%s1856_s8 + $0x26] sm:$0xff]  ;;  %v1593_v1 = vld [vmem:[%s1856_s8 + $0x2e] sm:$0xff] }
  0x1f   : > { %v1604_v45 = vld [vmem:[%s1856_s8 + $0x28] sm:$0xff] }
  0x20   : > { %565 = vrot.lane.b32.xlu1 %v1871_v6, %s1785_s15  ;;  %v1570_v51 = vld [vmem:[%s1856_s8 + $0x3] sm:$0xff]  ;;  %v1599_v5 = vld [vmem:[%s1856_s8 + $0x2f] sm:$0xff] }
  0x21   : > { %541 = vrot.lane.b32.xlu0 %v1612_v7, %s1786_s16 }
  0x22   : > { %399 = vrot.lane.b32.xlu2 %v1624_v8, %s1780_s10 }
  0x28   : > { %423 = vrot.lane.b32.xlu1 %v1583_v9, %s1783_s13 }
  0x29   : > { %589 = vrot.lane.b32.xlu0 %v1624_v8, %s1787_s17 }
  0x2a   : > { %613 = vrot.lane.b32.xlu2 %v1583_v9, %s1788_s18 }
  0x30   : > { %471 = vrot.lane.b32.xlu1 %v1595_v10, %s1782_s12 }
  0x31   : > { %447 = vrot.lane.b32.xlu0 %v1589_v11, %s1779_s9 }
  0x32   : > { %495 = vrot.lane.b32.xlu2 %v1601_v12, %s1781_s11  ;;  %v1605_v12 = vld [vmem:[%s1856_s8 + $0x30] sm:$0xff] }
  0x38   : > { %543 = vrot.lane.b32.xlu1 %v1613_v13, %s1786_s16  ;;  %v1611_v13 = vld [vmem:[%s1856_s8 + $0x31] sm:$0xff] }
  0x39   : > { %519 = vrot.lane.b32.xlu0 %v1607_v14, %s1784_s14 }
  0x3a   : > { %567 = vrot.lane.b32.xlu2 %v1894_v15, %s1785_s15 }
  0x40   : > { %591 = vrot.lane.b32.xlu1 %v1625_v16, %s1787_s17 }
  0x41   : > { %401 = vrot.lane.b32.xlu0 %v1625_v16, %s1780_s10  ;;  %v1617_v16 = vld [vmem:[%s1856_s8 + $0x32] sm:$0xff] }
  0x42   : > { %425 = vrot.lane.b32.xlu2 %v1631_v17, %s1783_s13 }
  0x48   : > { %449 = vrot.lane.b32.xlu1 %v1590_v18, %s1779_s9 }
  0x49   : > { %615 = vrot.lane.b32.xlu0 %v1631_v17, %s1788_s18 }
  0x4a   : > { %473 = vrot.lane.b32.xlu2 %v1596_v19, %s1782_s12  ;;  %v1623_v19 = vld [vmem:[%s1856_s8 + $0x33] sm:$0xff] }
  0x50   : > { %521 = vrot.lane.b32.xlu1 %v1608_v20, %s1784_s14  ;;  %v1629_v20 = vld [vmem:[%s1856_s8 + $0x34] sm:$0xff] }
  0x51   : > { %497 = vrot.lane.b32.xlu0 %v1602_v21, %s1781_s11 }
  0x52   : > { %545 = vrot.lane.b32.xlu2 %v1614_v22, %s1786_s16 }
  0x58   : > { %403 = vrot.lane.b32.xlu1 %v1579_v23, %s1780_s10 }
  0x59   : > { %569 = vrot.lane.b32.xlu0 %v1916_v24, %s1785_s15 }
  0x5a   : > { %593 = vrot.lane.b32.xlu2 %v1579_v23, %s1787_s17  ;;  %v1635_v23 = vld [vmem:[%s1856_s8 + $0x35] sm:$0xff] }
  0x60   : > { %617 = vrot.lane.b32.xlu1 %v1632_v25, %s1788_s18 }
  0x61   : > { %427 = vrot.lane.b32.xlu0 %v1632_v25, %s1783_s13 }
  0x62   : > { %451 = vrot.lane.b32.xlu2 %v1591_v26, %s1779_s9 }
  0x68   : > { %499 = vrot.lane.b32.xlu1 %v1603_v28, %s1781_s11 }
  0x69   : > { %475 = vrot.lane.b32.xlu0 %v1597_v27, %s1782_s12 }
  0x6a   : > { %523 = vrot.lane.b32.xlu2 %v1609_v29, %s1784_s14 }
  0x6c   : > { %v494_v32 = vpop.permute.xlu2 %493 }
  0x70   : > { %571 = vrot.lane.b32.xlu1 %v1935_v31, %s1785_s15 }
  0x71   : > { %547 = vrot.lane.b32.xlu0 %v1615_v30, %s1786_s16 }
  0x72   : > { %595 = vrot.lane.b32.xlu2 %v1580_v34, %s1787_s17 }
  0x74   : > { %v518_v38 = vpop.permute.xlu2 %517 }
  0x78   : > { %405 = vrot.lane.b32.xlu1 %v1580_v34, %s1780_s10 }
  0x79   : > { %619 = vrot.lane.b32.xlu0 %v1633_v37, %s1788_s18 }
  0x7a   : > { %429 = vrot.lane.b32.xlu2 %v1633_v37, %s1783_s13 }
  0x7c   : > { %v1966_v44 = vpop.permute.xlu2 %399 }
  0x7d   : > { %v633_v22 = vsel %vm631_vm1, %v1871_v6, %v1966_v44 }
  0x80   : > { %477 = vrot.lane.b32.xlu1 %v1598_v43, %s1782_s12 }
  0x81   : > { %453 = vrot.lane.b32.xlu0 %v1592_v42, %s1779_s9 }
  0x82   : > { %v446_v46 = vpop.permute.xlu1 %445  ;;  %501 = vrot.lane.b32.xlu2 %v1604_v45, %s1781_s11 }
  0x83   : > { %v398_v47 = vpop.permute.xlu0 %397 }
  0x84   : > { %v614_v50 = vpop.permute.xlu2 %613  ;;  %v632_v53 = vsel %vm631_vm1, %v1570_v51, %v398_v47 }
  0x88   : > { %549 = vrot.lane.b32.xlu1 %v1616_v49, %s1786_s16 }
  0x89   : > { %525 = vrot.lane.b32.xlu0 %v1610_v48, %s1784_s14 }
  0x8a   : > { %v470_v54 = vpop.permute.xlu1 %469  ;;  %573 = vrot.lane.b32.xlu2 %v1978_v52, %s1785_s15 }
  0x8b   : > { %v422_v55 = vpop.permute.xlu0 %421 }
  0x8c   : > { %v639_v56 = vsel %vm638_vm2, %v632_v53, %v422_v55  ;;  %v496_v60 = vpop.permute.xlu2 %495 }
  0x8d   : > { %v646_v57 = vsel %vm645_vm3, %v639_v56, %v446_v46 }
  0x8e   : > { %v653_v61 = vsel %vm652_vm4, %v646_v57, %v470_v54 }
  0x8f   : > { %v660_v0 = vsel %vm659_vm5, %v653_v61, %v494_v32 }
  0x90   : > { %621 = vrot.lane.b32.xlu1 %v1634_v59, %s1788_s18  ;;  %v667_v3 = vsel %vm666_vm6, %v660_v0, %v518_v38 }
  0x91   : > { %597 = vrot.lane.b32.xlu0 %v1628_v58, %s1787_s17 }
  0x92   : > { %v566_v62 = vpop.permute.xlu1 %565  ;;  %407 = vrot.lane.b32.xlu2 %v1628_v58, %s1780_s10  ;;  %s1790_s10 = smov 96  }
  0x93   : > { %v542_v63 = vpop.permute.xlu0 %541 }
  0x94   : > { %v568_v2 = vpop.permute.xlu2 %567  ;;  %v674_v4 = vsel %vm673_vm7, %v667_v3, %v542_v63 }
  0x95   : > { %v681_v9 = vsel %vm680_vm8, %v674_v4, %v566_v62 }
  0x98   : > { %455 = vrot.lane.b32.xlu1 %v1593_v1, %s1779_s9 }
  0x99   : > { %431 = vrot.lane.b32.xlu0 %v1634_v59, %s1783_s13 }
  0x9a   : > { %v424_v7 = vpop.permute.xlu1 %423  ;;  %479 = vrot.lane.b32.xlu2 %v1599_v5, %s1782_s12 }
  0x9b   : > { %v590_v8 = vpop.permute.xlu0 %589  ;;  %v640_v27 = vsel %vm638_vm2, %v633_v22, %v424_v7 }
  0x9c   : > { %v688_v10 = vsel %vm687_vm9, %v681_v9, %v590_v8  ;;  %v426_v14 = vpop.permute.xlu2 %425 }
  0x9d   : > { %v695_v11 = vsel %vm694_vm10, %v688_v10, %v614_v50 }
  0x9e   : > { %1637 = vmatmul.msk.f32.vlgmr.msra.gmra.mxu0 %vm711_vm11, %v695_v11 }
  0xa0   : > { %527 = vrot.lane.b32.xlu1 %v1611_v13, %s1784_s14 }
  0xa1   : > { %503 = vrot.lane.b32.xlu0 %v1605_v12, %s1781_s11  ;;  %s1791_s11 = smov 64  }
  0xa2   : > { %v472_v17 = vpop.permute.xlu1 %471  ;;  %551 = vrot.lane.b32.xlu2 %v1617_v16, %s1786_s16 }
  0xa3   : > { %v448_v18 = vpop.permute.xlu0 %447 }
  0xa4   : > { %v474_v21 = vpop.permute.xlu2 %473  ;;  %v647_v28 = vsel %vm645_vm3, %v640_v27, %v448_v18 }
  0xa5   : > { %v654_v30 = vsel %vm652_vm4, %v647_v28, %v472_v17 }
  0xa6   : > { %v661_v32 = vsel %vm659_vm5, %v654_v30, %v496_v60 }
  0xa8   : > { %599 = vrot.lane.b32.xlu1 %v1629_v20, %s1787_s17 }
  0xa9   : > { %575 = vrot.lane.b32.xlu0 %v1623_v19, %s1785_s15 }
  0xaa   : > { %v544_v25 = vpop.permute.xlu1 %543  ;;  %623 = vrot.lane.b32.xlu2 %v1635_v23, %s1788_s18 }
  0xab   : > { %v520_v26 = vpop.permute.xlu0 %519 }
  0xac   : > { %v546_v29 = vpop.permute.xlu2 %545  ;;  %v668_v34 = vsel %vm666_vm6, %v661_v32, %v520_v26 }
  0xad   : > { %v675_v36 = vsel %vm673_vm7, %v668_v34, %v544_v25 }
  0xae   : > { %v682_v37 = vsel %vm680_vm8, %v675_v36, %v568_v2 }
  0xb2   : > { %v592_v33 = vpop.permute.xlu1 %591 }
  0xb3   : > { %v402_v6 = vpop.permute.xlu0 %401  ;;  %v689_v38 = vsel %vm687_vm9, %v682_v37, %v592_v33 }
  0xb4   : > { %v594_v35 = vpop.permute.xlu2 %593  ;;  %v634_v43 = vsel %vm631_vm1, %v1894_v15, %v402_v6 }
  0xb5   : > { %v641_v46 = vsel %vm638_vm2, %v634_v43, %v426_v14 }
  0xba   : > { %v450_v39 = vpop.permute.xlu1 %449 }
  0xbb   : > { %v616_v40 = vpop.permute.xlu0 %615  ;;  %v648_v47 = vsel %vm645_vm3, %v641_v46, %v450_v39  ;;  %v2074_v46 = vld [vmem:[%s2476_s2] ss:$0 sm:$0xff] }
  0xbc   : > { %v696_v41 = vsel %vm694_vm10, %v689_v38, %v616_v40  ;;  %v452_v42 = vpop.permute.xlu2 %451  ;;  %v655_v48 = vsel %vm652_vm4, %v648_v47, %v474_v21 }
  0xbd   : > { %1638 = vmatmul.msk.f32.gmra.mxu0 %vm711_vm11, %v696_v41 }
  0xc2   : > { %v522_v44 = vpop.permute.xlu1 %521 }
  0xc3   : > { %v498_v45 = vpop.permute.xlu0 %497 }
  0xc4   : > { %v662_v49 = vsel %vm659_vm5, %v655_v48, %v498_v45  ;;  %v524_v50 = vpop.permute.xlu2 %523 }
  0xc5   : > { %v669_v54 = vsel %vm666_vm6, %v662_v49, %v522_v44 }
  0xc6   : > { %v676_v55 = vsel %vm673_vm7, %v669_v54, %v546_v29 }
  0xca   : > { %v404_v51 = vpop.permute.xlu1 %403 }
  0xcb   : > { %v570_v53 = vpop.permute.xlu0 %569  ;;  %v635_v61 = vsel %vm631_vm1, %v1916_v24, %v404_v51 }
  0xcc   : > { %v683_v56 = vsel %vm680_vm8, %v676_v55, %v570_v53  ;;  %v596_v60 = vpop.permute.xlu2 %595 }
  0xcd   : > { %v690_v15 = vsel %vm687_vm9, %v683_v56, %v594_v35 }
  0xd2   : > { %v618_v57 = vpop.permute.xlu1 %617 }
  0xd3   : > { %v428_v58 = vpop.permute.xlu0 %427  ;;  %v697_v59 = vsel %vm694_vm10, %v690_v15, %v618_v57  ;;  %v1789_v57 = vmov 0.0  }
  0xd4   : > { %1639 = vmatmul.msk.f32.gmra.mxu0 %vm711_vm11, %v697_v59  ;;  %v642_v62 = vsel %vm638_vm2, %v635_v61, %v428_v58  ;;  %v430_v3 = vpop.permute.xlu2 %429 }
  0xd5   : > { %v649_v1 = vsel %vm645_vm3, %v642_v62, %v452_v42 }
  0xda   : > { %v500_v0 = vpop.permute.xlu1 %499 }
  0xdb   : > { %v476_v63 = vpop.permute.xlu0 %475 }
  0xdc   : > { %v656_v2 = vsel %vm652_vm4, %v649_v1, %v476_v63  ;;  %v502_v24 = vpop.permute.xlu2 %501 }
  0xdd   : > { %v663_v4 = vsel %vm659_vm5, %v656_v2, %v500_v0 }
  0xde   : > { %v670_v8 = vsel %vm666_vm6, %v663_v4, %v524_v50 }
  0xe2   : > { %v572_v7 = vpop.permute.xlu1 %571 }
  0xe3   : > { %v548_v5 = vpop.permute.xlu0 %547 }
  0xe4   : > { %v677_v9 = vsel %vm673_vm7, %v670_v8, %v548_v5  ;;  %v574_v17 = vpop.permute.xlu2 %573 }
  0xe5   : > { %v684_v10 = vsel %vm680_vm8, %v677_v9, %v572_v7 }
  0xe6   : > { %v691_v11 = vsel %vm687_vm9, %v684_v10, %v596_v60 }
  0xea   : > { %v406_v13 = vpop.permute.xlu1 %405 }
  0xeb   : > { %v620_v12 = vpop.permute.xlu0 %619  ;;  %v636_v16 = vsel %vm631_vm1, %v1935_v31, %v406_v13 }
  0xec   : > { %v698_v14 = vsel %vm694_vm10, %v691_v11, %v620_v12  ;;  %v643_v20 = vsel %vm638_vm2, %v636_v16, %v430_v3  ;;  %v408_v27 = vpop.permute.xlu2 %407 }
  0xed   : > { %1640 = vmatmul.msk.f32.gmra.mxu0 %vm711_vm11, %v698_v14  ;;  %v637_v35 = vsel %vm631_vm1, %v1978_v52, %v408_v27 }
  0xf2   : > { %v478_v19 = vpop.permute.xlu1 %477 }
  0xf3   : > { %v454_v18 = vpop.permute.xlu0 %453 }
  0xf4   : > { %v650_v21 = vsel %vm645_vm3, %v643_v20, %v454_v18  ;;  %v480_v34 = vpop.permute.xlu2 %479 }
  0xf5   : > { %v657_v22 = vsel %vm652_vm4, %v650_v21, %v478_v19 }
  0xf6   : > { %v664_v26 = vsel %vm659_vm5, %v657_v22, %v502_v24 }
  0xfa   : > { %v550_v25 = vpop.permute.xlu1 %549 }
  0xfb   : > { %v526_v23 = vpop.permute.xlu0 %525 }
  0xfc   : > { %v671_v28 = vsel %vm666_vm6, %v664_v26, %v526_v23  ;;  %v552_v39 = vpop.permute.xlu2 %551 }
  0xfd   : > { %v678_v29 = vsel %vm673_vm7, %v671_v28, %v550_v25 }
  0xfe   : > { %v685_v31 = vsel %vm680_vm8, %v678_v29, %v574_v17 }
 0x102   : > { %v622_v32 = vpop.permute.xlu1 %621 }
 0x103   : > { %v598_v30 = vpop.permute.xlu0 %597 }
 0x104   : > { %v692_v33 = vsel %vm687_vm9, %v685_v31, %v598_v30  ;;  %v624_v52 = vpop.permute.xlu2 %623 }
 0x105   : > { %v699_v6 = vsel %vm694_vm10, %v692_v33, %v622_v32 }
 0x106   : > { %1641 = vmatmul.msk.f32.gmra.mxu0 %vm711_vm11, %v699_v6 }
 0x10a   : > { %v456_v37 = vpop.permute.xlu1 %455 }
 0x10b   : > { %v432_v36 = vpop.permute.xlu0 %431 }
 0x10c   : > { %v644_v38 = vsel %vm638_vm2, %v637_v35, %v432_v36 }
 0x10d   : > { %v651_v40 = vsel %vm645_vm3, %v644_v38, %v456_v37  ;;  %v1039_v38 = vld [vmem:[%s2477_s3 + $0x78] sm:$0xff] }
 0x10e   : > { %v658_v43 = vsel %vm652_vm4, %v651_v40, %v480_v34  ;;  %1084 = vmatpush.msra.mxu1 %v1039_v38  ;;  %v1038_v40 = vld [vmem:[%s2477_s3 + $0x70] sm:$0xff] }
 0x110   : > { %1085 = vmatpush.msra.mxu1 %v1038_v40 }
 0x112   : > { %v528_v42 = vpop.permute.xlu1 %527 }
 0x113   : > { %v504_v41 = vpop.permute.xlu0 %503 }
 0x114   : > { %v665_v44 = vsel %vm659_vm5, %v658_v43, %v504_v41  ;;  %v1054_v41 = vld [vmem:[%s2477_s3 + $0xf0] sm:$0xff] }
 0x115   : > { %v672_v45 = vsel %vm666_vm6, %v665_v44, %v528_v42 }
 0x116   : > { %v679_v47 = vsel %vm673_vm7, %v672_v45, %v552_v39  ;;  %v1055_v39 = vld [vmem:[%s2477_s3 + $0xf8] sm:$0xff] }
 0x117   : > { %1113 = vmatpush.msra.mxu2 %v1055_v39 }
 0x119   : > { %1114 = vmatpush.msra.mxu2 %v1054_v41 }
 0x11a   : > { %v600_v53 = vpop.permute.xlu1 %599 }
 0x11b   : > { %v576_v48 = vpop.permute.xlu0 %575  ;;  %v751_v49 = vpop.f32.mrf.mxu0 }
 0x11c   : > { %v686_v50 = vsel %vm680_vm8, %v679_v47, %v576_v48  ;;  %v752_v51 = vadd.f32 %v2074_v46, %v751_v49  ;;  %v1037_v49 = vld [vmem:[%s2477_s3 + $0x68] sm:$0xff] }
 0x11d   : > { %v693_v54 = vsel %vm687_vm9, %v686_v50, %v600_v53  ;;  %v1036_v50 = vld [vmem:[%s2477_s3 + $0x60] sm:$0xff]  ;;  %1086 = vmatpush.msra.mxu1 %v1037_v49  ;;  %v1035_v53 = vld [vmem:[%s2477_s3 + $0x58] sm:$0xff] }
 0x11e   : > { %v769_v55 = vmul.f32 0.1, %v752_v51  ;;  %v700_v56 = vsel %vm694_vm10, %v693_v54, %v624_v52  ;;  %v1051_v54 = vld [vmem:[%s2477_s3 + $0xd8] sm:$0xff] }
 0x11f   : > { %1642 = vmatmul.msk.f32.gmra.mxu0 %vm711_vm11, %v700_v56  ;;  %1087 = vmatpush.msra.mxu1 %v1036_v50  ;;  %v1034_v56 = vld [vmem:[%s2477_s3 + $0x50] sm:$0xff] }
 0x120   : > { %v775_v15 = vmax.f32 %v752_v51, %v769_v55  ;;  %v1052_v51 = vld [vmem:[%s2477_s3 + $0xe0] sm:$0xff]  ;;  %v1067_v55 = vld [vmem:[%s2477_s3 + $0x158] sm:$0xff] }
 0x121   : > { %1146 = vmatpush.msra.mxu3 %v1067_v55  ;;  %1088 = vmatpush.msra.mxu1 %v1035_v53 }
 0x122   : > { %781 = vst.msk [vmem:[#allocation2] sm:$0xff] %vm680_vm8, %v775_v15  ;;  %v1050_v15 = vld [vmem:[%s2477_s3 + $0xd0] sm:$0xff] }
 0x123   : > { %851 = vst.msk [vmem:[#allocation2] sm:$0xff] %vm680_vm8, %v1789_v57  ;;  %1089 = vmatpush.msra.mxu1 %v1034_v56 }
 0x13a   : > { %v754_v58 = vpop.f32.mrf.mxu0 }
 0x13b   : > { %v755_v59 = vadd.f32 %v2074_v46, %v754_v58  ;;  %v1066_v58 = vld [vmem:[%s2477_s3 + $0x150] sm:$0xff] }
 0x13c   : > { %1147 = vmatpush.msra.mxu3 %v1066_v58 }
 0x13d   : > { %v770_v60 = vmul.f32 0.1, %v755_v59 }
 0x13f   : > { %v776_v61 = vmax.f32 %v755_v59, %v770_v60 }
 0x141   : > { %782 = vst.msk [vmem:[#allocation2 + $0x8] sm:$0xff] %vm680_vm8, %v776_v61 }
 0x142   : > { %852 = vst.msk [vmem:[#allocation2 + $0x8] sm:$0xff] %vm680_vm8, %v1789_v57 }
 0x149   : > { %v861_v62 = vld [vmem:[#allocation2 + $0x4] sm:$0xff] }
 0x14a   : > { %v877_v63 = vld [vmem:[#allocation2 + $0x8] sm:$0xff] }
 0x14b   : > { %v1702_v0 = vpack.i.bf16 %v861_v62, %v877_v63  ;;  %v869_v7 = vld [vmem:[#allocation2 + $0x6] sm:$0xff] }
 0x14c   : > { %v865_v8 = vld [vmem:[#allocation2 + $0x5] sm:$0xff] }
 0x14d   : > { %1703 = vrot.lane.b32.xlu0 %v1702_v0, %s1785_s15  ;;  %v1033_v62 = vld [vmem:[%s2477_s3 + $0x48] sm:$0xff] }
 0x14e   : > { %v1049_v63 = vld [vmem:[%s2477_s3 + $0xc8] sm:$0xff]  ;;  %1090 = vmatpush.msra.mxu1 %v1033_v62 }
 0x14f   : > { %v1065_v0 = vld [vmem:[%s2477_s3 + $0x148] sm:$0xff] }
 0x150   : > { %1148 = vmatpush.msra.mxu3 %v1065_v0 }
 0x151   : > { %v757_v1 = vpop.f32.mrf.mxu0 }
 0x152   : > { %v758_v2 = vadd.f32 %v2074_v46, %v757_v1  ;;  %v1032_v1 = vld [vmem:[%s2477_s3 + $0x40] sm:$0xff] }
 0x153   : > { %1091 = vmatpush.msra.mxu1 %v1032_v1 }
 0x154   : > { %v771_v3 = vmul.f32 0.1, %v758_v2 }
 0x156   : > { %v777_v4 = vmax.f32 %v758_v2, %v771_v3  ;;  %v1048_v2 = vld [vmem:[%s2477_s3 + $0xc0] sm:$0xff] }
 0x157   : > { %v1064_v3 = vld [vmem:[%s2477_s3 + $0x140] sm:$0xff] }
 0x158   : > { %783 = vst.msk [vmem:[#allocation2 + $0x10] sm:$0xff] %vm680_vm8, %v777_v4  ;;  %v1031_v4 = vld [vmem:[%s2477_s3 + $0x38] sm:$0xff]  ;;  %1149 = vmatpush.msra.mxu3 %v1064_v3 }
 0x159   : > { %1092 = vmatpush.msra.mxu1 %v1031_v4 }
 0x15f   : > { %v829_v5 = vld [vmem:[#allocation2 + $0x10] sm:$0xff] }
 0x160   : > { %853 = vst.msk [vmem:[#allocation2 + $0x10] sm:$0xff] %vm680_vm8, %v829_v5 }
 0x167   : > { %v862_v9 = vld [vmem:[#allocation2 + $0xc] sm:$0xff] }
 0x168   : > { %v885_v10 = vld [vmem:[#allocation2 + $0xa] sm:$0xff]  ;;  %898 = vrot.lane.b32.xlu0 %v862_v9, %s1785_s15 }
 0x169   : > { %v881_v24 = vld [vmem:[#allocation2 + $0x9] sm:$0xff]  ;;  %v1712_v11 = vpack.i.bf16 %v869_v7, %v885_v10  ;;  %v1047_v7 = vld [vmem:[%s2477_s3 + $0xb8] sm:$0xff] }
 0x16a   : > { %v1707_v12 = vpack.i.bf16 %v865_v8, %v881_v24  ;;  %v760_v13 = vpop.f32.mrf.mxu0  ;;  %v866_v18 = vld [vmem:[#allocation2 + $0xd] sm:$0xff]  ;;  %v1063_v10 = vld [vmem:[%s2477_s3 + $0x138] sm:$0xff] }
 0x16b   : > { %v761_v14 = vadd.f32 %v2074_v46, %v760_v13  ;;  %1713 = vrot.lane.b32.xlu2 %v1712_v11, %s1790_s10  ;;  %v878_v20 = vld [vmem:[#allocation2 + $0x10] sm:$0xff]  ;;  %v1029_v11 = vld [vmem:[%s2477_s3 + $0x28] sm:$0xff]  ;;  %1150 = vmatpush.msra.mxu3 %v1063_v10 }
 0x16c   : > { %1708 = vrot.lane.b32.xlu1 %v1707_v12, %s1791_s11  ;;  %v870_v22 = vld [vmem:[#allocation2 + $0xe] sm:$0xff] }
 0x16d   : > { %v772_v16 = vmul.f32 0.1, %v761_v14  ;;  %v1030_v8 = vld [vmem:[%s2477_s3 + $0x30] sm:$0xff]  ;;  %v1045_v12 = vld [vmem:[%s2477_s3 + $0xa8] sm:$0xff] }
 0x16e   : > { %v1046_v9 = vld [vmem:[%s2477_s3 + $0xb0] sm:$0xff]  ;;  %1093 = vmatpush.msra.mxu1 %v1030_v8 }
 0x16f   : > { %v778_v17 = vmax.f32 %v761_v14, %v772_v16  ;;  %v1062_v13 = vld [vmem:[%s2477_s3 + $0x130] sm:$0xff]  ;;  %v1028_v14 = vld [vmem:[%s2477_s3 + $0x20] sm:$0xff] }
 0x170   : > { %1094 = vmatpush.msra.mxu1 %v1029_v11  ;;  %v1044_v16 = vld [vmem:[%s2477_s3 + $0xa0] sm:$0xff]  ;;  %1151 = vmatpush.msra.mxu3 %v1062_v13  ;;  %v858_v49 = vld [vmem:[#allocation2 + $0xb] sm:$0xff] }
 0x171   : > { %784 = vst.msk [vmem:[#allocation2 + $0x18] sm:$0xff] %vm680_vm8, %v778_v17  ;;  %v1027_v17 = vld [vmem:[%s2477_s3 + $0x18] sm:$0xff] }
 0x172   : > { %1095 = vmatpush.msra.mxu1 %v1028_v14 }
 0x174   : > { %914 = vrot.lane.b32.xlu1 %v866_v18, %s1791_s11  ;;  %v1043_v18 = vld [vmem:[%s2477_s3 + $0x98] sm:$0xff]  ;;  %1096 = vmatpush.msra.mxu1 %v1027_v17 }
 0x178   : > { %v830_v19 = vld [vmem:[#allocation2 + $0x18] sm:$0xff] }
 0x179   : > { %854 = vst.msk [vmem:[#allocation2 + $0x18] sm:$0xff] %vm680_vm8, %v830_v19  ;;  %v1061_v19 = vld [vmem:[%s2477_s3 + $0x128] sm:$0xff] }
 0x17a   : > { %1152 = vmatpush.msra.mxu3 %v1061_v19 }
 0x180   : > { %v879_v21 = vld [vmem:[#allocation2 + $0x18] sm:$0xff] }
 0x181   : > { %v886_v23 = vld [vmem:[#allocation2 + $0x12] sm:$0xff]  ;;  %v1717_v25 = vpack.i.bf16 %v879_v21, %v878_v20 }
 0x182   : > { %v1722_v26 = vpack.i.bf16 %v870_v22, %v886_v23  ;;  %v863_v30 = vld [vmem:[#allocation2 + $0x14] sm:$0xff]  ;;  %v1060_v22 = vld [vmem:[%s2477_s3 + $0x120] sm:$0xff]  ;;  %v1025_v23 = vld [vmem:[%s2477_s3 + $0x8] sm:$0xff] }
 0x183   : > { %v763_v27 = vpop.f32.mrf.mxu0  ;;  %1718 = vrot.lane.b32.xlu2 %v1717_v25, %s1785_s15  ;;  %v871_v32 = vld [vmem:[#allocation2 + $0x16] sm:$0xff]  ;;  %v1041_v25 = vld [vmem:[%s2477_s3 + $0x88] sm:$0xff]  ;;  %1153 = vmatpush.msra.mxu3 %v1060_v22 }
 0x184   : > { %1723 = vrot.lane.b32.xlu1 %v1722_v26, %s1790_s10  ;;  %v764_v28 = vadd.f32 %v2074_v46, %v763_v27  ;;  %v882_v33 = vld [vmem:[#allocation2 + $0x11] sm:$0xff]  ;;  %v1024_v27 = vld [vmem:[%s2477_s3] sm:$0xff] }
 0x185   : > { %v867_v44 = vld [vmem:[#allocation2 + $0x15] sm:$0xff] }
 0x186   : > { %v773_v29 = vmul.f32 0.1, %v764_v28  ;;  %v1026_v20 = vld [vmem:[%s2477_s3 + $0x10] sm:$0xff]  ;;  %v1059_v26 = vld [vmem:[%s2477_s3 + $0x118] sm:$0xff] }
 0x187   : > { %v1042_v21 = vld [vmem:[%s2477_s3 + $0x90] sm:$0xff]  ;;  %1097 = vmatpush.msra.mxu1 %v1026_v20  ;;  %1154 = vmatpush.msra.mxu3 %v1059_v26 }
 0x188   : > { %v779_v31 = vmax.f32 %v764_v28, %v773_v29  ;;  %v1040_v28 = vld [vmem:[%s2477_s3 + $0x80] sm:$0xff]  ;;  %v1058_v29 = vld [vmem:[%s2477_s3 + $0x110] sm:$0xff] }
 0x189   : > { %1098 = vmatpush.msra.mxu1 %v1025_v23  ;;  %1155 = vmatpush.msra.mxu3 %v1058_v29  ;;  %v875_v8 = vld [vmem:[#allocation2 + $0x17] sm:$0xff] }
 0x18a   : > { %785 = vst.msk [vmem:[#allocation2 + $0x20] sm:$0xff] %vm680_vm8, %v779_v31  ;;  %v1057_v31 = vld [vmem:[%s2477_s3 + $0x108] sm:$0xff] }
 0x18b   : > { %855 = vst.msk [vmem:[#allocation2 + $0x20] sm:$0xff] %vm680_vm8, %v1789_v57  ;;  %900 = vrot.lane.b32.xlu2 %v863_v30, %s1785_s15  ;;  %1099 = vmatpush.msra.mxu1 %v1024_v27  ;;  %v1056_v30 = vld [vmem:[%s2477_s3 + $0x100] sm:$0xff] }
 0x18c   : > { %1156 = vmatpush.msra.mxu3 %v1057_v31 }
 0x18e   : > { %1157 = vmatpush.msra.mxu3 %v1056_v30 }
 0x192   : > { %v864_v6 = vld [vmem:[#allocation2 + $0x1c] sm:$0xff] }
 0x193   : > { %v887_v34 = vld [vmem:[#allocation2 + $0x1a] sm:$0xff]  ;;  %902 = vrot.lane.b32.xlu2 %v864_v6, %s1785_s15 }
 0x194   : > { %v883_v35 = vld [vmem:[#allocation2 + $0x19] sm:$0xff]  ;;  %v1732_v36 = vpack.i.bf16 %v871_v32, %v887_v34  ;;  %v857_v34 = vld [vmem:[#allocation2 + $0x3] sm:$0xff] }
 0x195   : > { %v1727_v37 = vpack.i.bf16 %v883_v35, %v882_v33  ;;  %v880_v42 = vld [vmem:[#allocation2 + $0x20] sm:$0xff] }
 0x196   : > { %1733 = vrot.lane.b32.xlu1 %v1732_v36, %s1790_s10  ;;  %v868_v48 = vld [vmem:[#allocation2 + $0x1d] sm:$0xff]  ;;  %v873_v35 = vld [vmem:[#allocation2 + $0x7] sm:$0xff] }
 0x197   : > { %1728 = vrot.lane.b32.xlu0 %v1727_v37, %s1791_s11  ;;  %v872_v24 = vld [vmem:[#allocation2 + $0x1e] sm:$0xff] }
 0x198   : > { %v860_v19 = vld [vmem:[#allocation2 + $0x1b] sm:$0xff] }
 0x19c   : > { %v766_v43 = vpop.f32.mrf.mxu0 }
 0x19d   : > { %v767_v45 = vadd.f32 %v2074_v46, %v766_v43  ;;  %v1053_v46 = vld [vmem:[%s2477_s3 + $0xe8] sm:$0xff] }
 0x19e   : > { %950 = vrot.lane.b32.xlu1 %v880_v42, %s1785_s15  ;;  %1115 = vmatpush.msra.mxu2 %v1053_v46 }
 0x19f   : > { %916 = vrot.lane.b32.xlu0 %v867_v44, %s1791_s11  ;;  %v774_v52 = vmul.f32 0.1, %v767_v45 }
 0x1a0   : > { %1116 = vmatpush.msra.mxu2 %v1052_v51 }
 0x1a1   : > { %v780_v47 = vmax.f32 %v767_v45, %v774_v52 }
 0x1a2   : > { %1117 = vmatpush.msra.mxu2 %v1051_v54 }
 0x1a3   : > { %786 = vst.msk [vmem:[#allocation2 + $0x28] sm:$0xff] %vm680_vm8, %v780_v47 }
 0x1a4   : > { %856 = vst.msk [vmem:[#allocation2 + $0x28] sm:$0xff] %vm680_vm8, %v1789_v57  ;;  %1118 = vmatpush.msra.mxu2 %v1050_v15 }
 0x1a6   : > { %1119 = vmatpush.msra.mxu2 %v1049_v63 }
 0x1a7   : > { %918 = vrot.lane.b32.xlu0 %v868_v48, %s1791_s11 }
 0x1a8   : > { %1120 = vmatpush.msra.mxu2 %v1048_v2 }
 0x1aa   : > { %1121 = vmatpush.msra.mxu2 %v1047_v7  ;;  %v859_v7 = vld [vmem:[#allocation2 + $0x13] sm:$0xff] }
 0x1ab   : > { %v888_v59 = vld [vmem:[#allocation2 + $0x22] sm:$0xff] }
 0x1ac   : > { %v890_v60 = vld [vmem:[#allocation2 + $0x24] sm:$0xff]  ;;  %1122 = vmatpush.msra.mxu2 %v1046_v9 }
 0x1ad   : > { %v884_v61 = vld [vmem:[#allocation2 + $0x21] sm:$0xff]  ;;  %989 = vrot.lane.b32.xlu1 %v890_v60, %s1785_s15 }
 0x1ae   : > { %966 = vrot.lane.b32.xlu2 %v884_v61, %s1791_s11  ;;  %v891_v5 = vld [vmem:[#allocation2 + $0x25] sm:$0xff]  ;;  %1123 = vmatpush.msra.mxu2 %v1045_v12  ;;  %v874_v61 = vld [vmem:[#allocation2 + $0xf] sm:$0xff] }
 0x1af   : > { %982 = vrot.lane.b32.xlu0 %v888_v59, %s1790_s10  ;;  %v889_v27 = vld [vmem:[#allocation2 + $0x23] sm:$0xff] }
 0x1b0   : > { %1124 = vmatpush.msra.mxu2 %v1044_v16 }
 0x1b2   : > { %1125 = vmatpush.msra.mxu2 %v1043_v18 }
 0x1b4   : > { %1126 = vmatpush.msra.mxu2 %v1042_v21 }
 0x1b6   : > { %993 = vrot.lane.b32.xlu2 %v891_v5, %s1791_s11  ;;  %1127 = vmatpush.msra.mxu2 %v1041_v25  ;;  %v876_v25 = vld [vmem:[#allocation2 + $0x1f] sm:$0xff] }
 0x1b7   : > { %934 = vrot.lane.b32.xlu0 %v872_v24, %s1790_s10 }
 0x1b8   : > { %1128 = vmatpush.msra.mxu2 %v1040_v28 }
 0x1bf   : > { %v1704_v32 = vpop.permute.xlu0 %1703 }
 0x1c0   : > { %v1706_v33 = vunpack.i.h.bf16 %v1704_v32  ;;  %v1705_v6 = vunpack.i.l.bf16 %v1704_v32 }
 0x1c2   : > { %v996_v38 = vsel %vm680_vm8, %v857_v34, %v1706_v33  ;;  %v1010_v39 = vsel %vm680_vm8, %v873_v35, %v1705_v6 }
 0x1c5   : > { %v1714_v36 = vpop.permute.xlu2 %1713 }
 0x1c6   : > { %v1716_v42 = vunpack.i.h.bf16 %v1714_v36  ;;  %v1715_v43 = vunpack.i.l.bf16 %v1714_v36  ;;  %v1753_v36 = vld [vmem:[%s2478_s4] ss:$0 sm:$0xff] }
 0x1da   : > { %v899_v48 = vpop.permute.xlu0 %898 }
 0x1db   : > { %v997_v46 = vsel %vm680_vm8, %v858_v49, %v899_v48 }
 0x1dd   : > { %v1719_v56 = vpop.permute.xlu2 %1718 }
 0x1de   : > { %v1709_v37 = vpop.permute.xlu1 %1708  ;;  %v1720_v58 = vunpack.i.l.bf16 %v1719_v56  ;;  %v1721_v1 = vunpack.i.h.bf16 %v1719_v56 }
 0x1df   : > { %v1711_v40 = vunpack.i.h.bf16 %v1709_v37  ;;  %v1710_v41 = vunpack.i.l.bf16 %v1709_v37 }
 0x1e0   : > { %v1011_v63 = vsel %vm680_vm8, %v874_v61, %v1720_v58  ;;  %v1012_v12 = vsel %vm680_vm8, %v875_v8, %v1721_v1 }
 0x1e1   : > { %v1001_v44 = vsel %vm1000_vm12, %v996_v38, %v1711_v40  ;;  %v1014_v45 = vsel %vm1000_vm12, %v1010_v39, %v1710_v41 }
 0x1e2   : > { %v1006_v52 = vsel %vm1005_vm13, %v1001_v44, %v1716_v42  ;;  %v1018_v47 = vsel %vm1005_vm13, %v1014_v45, %v1715_v43 }
 0x1e3   : > { %1100 = vmatmul.f32.vlgmr.msra.gmra.mxu1 %v1006_v52  ;;  %1129 = vmatmul.f32.vlgmr.msra.gmra.mxu2 %v1018_v47 }
 0x1e5   : > { %v901_v15 = vpop.permute.xlu2 %900 }
 0x1e6   : > { %v915_v50 = vpop.permute.xlu1 %914  ;;  %v998_v9 = vsel %vm680_vm8, %v859_v7, %v901_v15 }
 0x1e7   : > { %v1002_v51 = vsel %vm1000_vm12, %v997_v46, %v915_v50 }
 0x1e8   : > { %1643 = vmatmul.msk.f32.vlgmr.msra.gmra.mxu3 %vm1005_vm13, %v1002_v51 }
 0x1ed   : > { %v903_v5 = vpop.permute.xlu2 %902 }
 0x1ee   : > { %v999_v21 = vsel %vm680_vm8, %v860_v19, %v903_v5 }
 0x1f6   : > { %v1724_v53 = vpop.permute.xlu1 %1723 }
 0x1f7   : > { %v1726_v54 = vunpack.i.h.bf16 %v1724_v53  ;;  %v1725_v62 = vunpack.i.l.bf16 %v1724_v53 }
 0x1f9   : > { %v1007_v55 = vsel %vm1005_vm13, %v1002_v51, %v1726_v54 }
 0x1fa   : > { %1103 = vmatmul.f32.gmra.mxu1 %v1007_v55 }
 0x208   : > { %v1734_v3 = vpop.permute.xlu1 %1733  ;;  %v967_v18 = vpop.permute.xlu2 %966 }
 0x209   : > { %v1729_v59 = vpop.permute.xlu0 %1728  ;;  %v1736_v10 = vunpack.i.h.bf16 %v1734_v3  ;;  %v1735_v24 = vunpack.i.l.bf16 %v1734_v3 }
 0x20a   : > { %v1730_v60 = vunpack.i.l.bf16 %v1729_v59  ;;  %v1731_v4 = vunpack.i.h.bf16 %v1729_v59 }
 0x20c   : > { %v1015_v0 = vsel %vm1000_vm12, %v1011_v63, %v1730_v60  ;;  %v1016_v14 = vsel %vm1000_vm12, %v1012_v12, %v1731_v4  ;;  %v1333_v12 = vld [vmem:[%s2479_s5 + $0x78] sm:$0xff] }
 0x20d   : > { %v1019_v2 = vsel %vm1005_vm13, %v1015_v0, %v1725_v62  ;;  %v1020_v17 = vsel %vm1005_vm13, %v1016_v14, %v1735_v24  ;;  %v1348_v24 = vld [vmem:[%s2479_s5 + $0xf0] sm:$0xff]  ;;  %v1347_v14 = vld [vmem:[%s2479_s5 + $0xe8] sm:$0xff]  ;;  %1372 = vmatpush.msrb.mxu3 %v1333_v12 }
 0x20e   : > { %1132 = vmatmul.f32.gmra.mxu2 %v1019_v2 }
 0x210   : > { %v951_v20 = vpop.permute.xlu1 %950  ;;  %v994_v28 = vpop.permute.xlu2 %993 }
 0x211   : > { %v917_v11 = vpop.permute.xlu0 %916  ;;  %v1013_v26 = vsel %vm680_vm8, %v876_v25, %v951_v20 }
 0x212   : > { %v1003_v13 = vsel %vm1000_vm12, %v998_v9, %v917_v11  ;;  %v1017_v31 = vsel %vm1000_vm12, %v1013_v26, %v967_v18  ;;  %v1346_v18 = vld [vmem:[%s2479_s5 + $0xe0] sm:$0xff]  ;;  %v1345_v26 = vld [vmem:[%s2479_s5 + $0xd8] sm:$0xff] }
 0x213   : > { %1644 = vmatmul.msk.f32.gmra.mxu3 %vm1005_vm13, %v1003_v13  ;;  %v1008_v16 = vsel %vm1005_vm13, %v1003_v13, %v1736_v10  ;;  %v1349_v10 = vld [vmem:[%s2479_s5 + $0xf8] sm:$0xff]  ;;  %v1332_v13 = vld [vmem:[%s2479_s5 + $0x70] sm:$0xff] }
 0x214   : > { %1106 = vmatmul.f32.gmra.mxu1 %v1008_v16  ;;  %1395 = vmatpush.msrb.mxu0 %v1349_v10  ;;  %v1331_v16 = vld [vmem:[%s2479_s5 + $0x68] sm:$0xff] }
 0x215   : > { %1373 = vmatpush.msrb.mxu3 %v1332_v13 }
 0x216   : > { %1135 = vmatmul.f32.gmra.mxu2 %v1020_v17  ;;  %1396 = vmatpush.msrb.mxu0 %v1348_v24 }
 0x217   : > { %1374 = vmatpush.msrb.mxu3 %v1331_v16 }
 0x218   : > { %1397 = vmatpush.msrb.mxu0 %v1347_v14 }
 0x219   : > { %v919_v22 = vpop.permute.xlu0 %918 }
 0x21a   : > { %v1004_v23 = vsel %vm1000_vm12, %v999_v21, %v919_v22  ;;  %1398 = vmatpush.msrb.mxu0 %v1346_v18 }
 0x21b   : > { %1645 = vmatmul.msk.f32.gmra.mxu3 %vm1005_vm13, %v1004_v23 }
 0x21c   : > { %1399 = vmatpush.msrb.mxu0 %v1345_v26 }
 0x21f   : > { %v990_v29 = vpop.permute.xlu1 %989 }
 0x220   : > { %v1022_v32 = vsel %vm680_vm8, %v889_v27, %v990_v29 }
 0x221   : > { %v983_v30 = vpop.permute.xlu0 %982  ;;  %v1023_v6 = vsel %vm1000_vm12, %v1022_v32, %v994_v28 }
 0x222   : > { %v1021_v33 = vsel %vm1005_vm13, %v1017_v31, %v983_v30 }
 0x223   : > { %1138 = vmatmul.f32.gmra.mxu2 %v1021_v33  ;;  %1646 = vmatmul.msk.f32.gmra.mxu3 %vm1005_vm13, %v1023_v6  ;;  %v1330_v33 = vld [vmem:[%s2479_s5 + $0x60] sm:$0xff]  ;;  %v1344_v6 = vld [vmem:[%s2479_s5 + $0xd0] sm:$0xff] }
 0x224   : > { %1375 = vmatpush.msrb.mxu3 %v1330_v33  ;;  %1400 = vmatpush.msrb.mxu0 %v1344_v6 }
 0x229   : > { %v935_v34 = vpop.permute.xlu0 %934 }
 0x22a   : > { %v1009_v35 = vsel %vm1005_vm13, %v1004_v23, %v935_v34  ;;  %v1329_v34 = vld [vmem:[%s2479_s5 + $0x58] sm:$0xff] }
 0x22b   : > { %1109 = vmatmul.f32.gmra.mxu1 %v1009_v35  ;;  %v1361_v35 = vld [vmem:[%s2479_s5 + $0x158] sm:$0xff]  ;;  %1376 = vmatpush.msrb.mxu3 %v1329_v34 }
 0x22c   : > { %1422 = vmatpush.msrb.mxu1 %v1361_v35  ;;  %1653 = vmatpush.msrb.mxu2 %v1361_v35 }
 0x260   : > { %v1101_v37 = vpop.f32.mrf.mxu1 }
 0x261   : > { %v1102_v39 = vadd.f32 %v1753_v36, %v1101_v37  ;;  %v1328_v37 = vld [vmem:[%s2479_s5 + $0x50] sm:$0xff] }
 0x262   : > { %1377 = vmatpush.msrb.mxu3 %v1328_v37 }
 0x266   : > { %v1130_v38 = vpop.f32.mrf.mxu2 }
 0x267   : > { %v1131_v40 = vadd.f32 %v1130_v38, %v1102_v39  ;;  %v1360_v38 = vld [vmem:[%s2479_s5 + $0x150] sm:$0xff]  ;;  %v1359_v39 = vld [vmem:[%s2479_s5 + $0x148] sm:$0xff] }
 0x268   : > { %1423 = vmatpush.msrb.mxu1 %v1360_v38  ;;  %1654 = vmatpush.msrb.mxu2 %v1360_v38 }
 0x26a   : > { %1424 = vmatpush.msrb.mxu1 %v1359_v39  ;;  %1655 = vmatpush.msrb.mxu2 %v1359_v39 }
 0x26b   : > { %v1159_v41 = vpop.f32.mrf.mxu3 }
 0x26c   : > { %v1160_v42 = vadd.f32 %v1159_v41, %v1131_v40  ;;  %v1327_v40 = vld [vmem:[%s2479_s5 + $0x48] sm:$0xff]  ;;  %v1342_v41 = vld [vmem:[%s2479_s5 + $0xc0] sm:$0xff] }
 0x26d   : > { %1378 = vmatpush.msrb.mxu3 %v1327_v40  ;;  %v1754_v40 = vld [vmem:[%s2480_s6] ss:$0 sm:$0xff] }
 0x26e   : > { %v1171_v43 = vmul.f32 0.1, %v1160_v42 }
 0x270   : > { %v1175_v44 = vmax.f32 %v1160_v42, %v1171_v43  ;;  %v1326_v42 = vld [vmem:[%s2479_s5 + $0x40] sm:$0xff] }
 0x271   : > { %v1358_v43 = vld [vmem:[%s2479_s5 + $0x140] sm:$0xff]  ;;  %1379 = vmatpush.msrb.mxu3 %v1326_v42 }
 0x272   : > { %1179 = vst.msk [vmem:[#allocation3] sm:$0xff] %vm680_vm8, %v1175_v44  ;;  %1425 = vmatpush.msrb.mxu1 %v1358_v43  ;;  %v1325_v44 = vld [vmem:[%s2479_s5 + $0x38] sm:$0xff]  ;;  %1656 = vmatpush.msrb.mxu2 %v1358_v43 }
 0x273   : > { %1225 = vst.msk [vmem:[#allocation3] sm:$0xff] %vm680_vm8, %v1789_v57  ;;  %1380 = vmatpush.msrb.mxu3 %v1325_v44 }
 0x277   : > { %v1104_v45 = vpop.f32.mrf.mxu1 }
 0x278   : > { %v1105_v47 = vadd.f32 %v1753_v36, %v1104_v45  ;;  %v1341_v45 = vld [vmem:[%s2479_s5 + $0xb8] sm:$0xff] }
 0x291   : > { %v1133_v52 = vpop.f32.mrf.mxu2  ;;  %v1107_v50 = vpop.f32.mrf.mxu1 }
 0x292   : > { %v1134_v48 = vadd.f32 %v1133_v52, %v1105_v47  ;;  %v1108_v54 = vadd.f32 %v1753_v36, %v1107_v50  ;;  %v1357_v52 = vld [vmem:[%s2479_s5 + $0x138] sm:$0xff]  ;;  %v1356_v47 = vld [vmem:[%s2479_s5 + $0x130] sm:$0xff]  ;;  %v1323_v50 = vld [vmem:[%s2479_s5 + $0x28] sm:$0xff] }
 0x293   : > { %1426 = vmatpush.msrb.mxu1 %v1357_v52  ;;  %1657 = vmatpush.msrb.mxu2 %v1357_v52 }
 0x295   : > { %1427 = vmatpush.msrb.mxu1 %v1356_v47  ;;  %1658 = vmatpush.msrb.mxu2 %v1356_v47 }
 0x296   : > { %v1162_v49 = vpop.f32.mrf.mxu3 }
 0x297   : > { %v1163_v46 = vadd.f32 %v1162_v49, %v1134_v48  ;;  %v1340_v48 = vld [vmem:[%s2479_s5 + $0xb0] sm:$0xff] }
 0x298   : > { %v1324_v49 = vld [vmem:[%s2479_s5 + $0x30] sm:$0xff] }
 0x299   : > { %v1172_v51 = vmul.f32 0.1, %v1163_v46  ;;  %v1136_v53 = vpop.f32.mrf.mxu2  ;;  %1381 = vmatpush.msrb.mxu3 %v1324_v49 }
 0x29a   : > { %v1137_v56 = vadd.f32 %v1136_v53, %v1108_v54  ;;  %v1339_v53 = vld [vmem:[%s2479_s5 + $0xa8] sm:$0xff]  ;;  %v1354_v54 = vld [vmem:[%s2479_s5 + $0x120] sm:$0xff] }
 0x29b   : > { %v1176_v55 = vmax.f32 %v1163_v46, %v1172_v51  ;;  %v1355_v46 = vld [vmem:[%s2479_s5 + $0x128] sm:$0xff]  ;;  %1382 = vmatpush.msrb.mxu3 %v1323_v50  ;;  %v1322_v51 = vld [vmem:[%s2479_s5 + $0x20] sm:$0xff] }
 0x29c   : > { %1428 = vmatpush.msrb.mxu1 %v1355_v46  ;;  %1659 = vmatpush.msrb.mxu2 %v1355_v46 }
 0x29d   : > { %1180 = vst.msk [vmem:[#allocation3 + $0x8] sm:$0xff] %vm680_vm8, %v1176_v55  ;;  %v1321_v55 = vld [vmem:[%s2479_s5 + $0x18] sm:$0xff]  ;;  %1383 = vmatpush.msrb.mxu3 %v1322_v51 }
 0x29e   : > { %v1165_v15 = vpop.f32.mrf.mxu3  ;;  %1429 = vmatpush.msrb.mxu1 %v1354_v54  ;;  %1660 = vmatpush.msrb.mxu2 %v1354_v54 }
 0x29f   : > { %v1166_v58 = vadd.f32 %v1165_v15, %v1137_v56  ;;  %v1353_v56 = vld [vmem:[%s2479_s5 + $0x118] sm:$0xff]  ;;  %v1338_v15 = vld [vmem:[%s2479_s5 + $0xa0] sm:$0xff]  ;;  %1384 = vmatpush.msrb.mxu3 %v1321_v55 }
 0x2a0   : > { %1430 = vmatpush.msrb.mxu1 %v1353_v56  ;;  %1661 = vmatpush.msrb.mxu2 %v1353_v56 }
 0x2a1   : > { %v1173_v59 = vmul.f32 0.1, %v1166_v58 }
 0x2a3   : > { %v1177_v60 = vmax.f32 %v1166_v58, %v1173_v59  ;;  %v1352_v58 = vld [vmem:[%s2479_s5 + $0x110] sm:$0xff] }
 0x2a4   : > { %v1210_v61 = vld [vmem:[#allocation3 + $0x8] sm:$0xff]  ;;  %v1320_v59 = vld [vmem:[%s2479_s5 + $0x10] sm:$0xff]  ;;  %1431 = vmatpush.msrb.mxu1 %v1352_v58  ;;  %1662 = vmatpush.msrb.mxu2 %v1352_v58 }
 0x2a5   : > { %1226 = vst.msk [vmem:[#allocation3 + $0x8] sm:$0xff] %vm680_vm8, %v1210_v61  ;;  %v1351_v61 = vld [vmem:[%s2479_s5 + $0x108] sm:$0xff]  ;;  %1385 = vmatpush.msrb.mxu3 %v1320_v59 }
 0x2a6   : > { %1181 = vst.msk [vmem:[#allocation3 + $0x10] sm:$0xff] %vm680_vm8, %v1177_v60  ;;  %v1139_v0 = vpop.f32.mrf.mxu2  ;;  %v1168_v1 = vpop.f32.mrf.mxu3  ;;  %v1337_v60 = vld [vmem:[%s2479_s5 + $0x98] sm:$0xff]  ;;  %1432 = vmatpush.msrb.mxu1 %v1351_v61  ;;  %1663 = vmatpush.msrb.mxu2 %v1351_v61 }
 0x2a8   : > { %v1110_v62 = vpop.f32.mrf.mxu1 }
 0x2a9   : > { %v1111_v63 = vadd.f32 %v1753_v36, %v1110_v62  ;;  %v1343_v36 = vld [vmem:[%s2479_s5 + $0xc8] sm:$0xff] }
 0x2aa   : > { %1401 = vmatpush.msrb.mxu0 %v1343_v36  ;;  %v1319_v62 = vld [vmem:[%s2479_s5 + $0x8] sm:$0xff] }
 0x2ab   : > { %v1140_v2 = vadd.f32 %v1139_v0, %v1111_v63  ;;  %1386 = vmatpush.msrb.mxu3 %v1319_v62  ;;  %v1318_v63 = vld [vmem:[%s2479_s5] sm:$0xff] }
 0x2ac   : > { %v1231_v3 = vld [vmem:[#allocation3 + $0x4] sm:$0xff]  ;;  %1402 = vmatpush.msrb.mxu0 %v1342_v41  ;;  %v1350_v0 = vld [vmem:[%s2479_s5 + $0x100] sm:$0xff] }
 0x2ad   : > { %v1239_v4 = vld [vmem:[#allocation3 + $0x8] sm:$0xff]  ;;  %v1211_v5 = vld [vmem:[#allocation3 + $0x10] sm:$0xff]  ;;  %v1169_v7 = vadd.f32 %v1168_v1, %v1140_v2  ;;  %v1336_v1 = vld [vmem:[%s2479_s5 + $0x90] sm:$0xff]  ;;  %1387 = vmatpush.msrb.mxu3 %v1318_v63  ;;  %1433 = vmatpush.msrb.mxu1 %v1350_v0 }
 0x2ae   : > { %v1737_v8 = vpack.i.bf16 %v1239_v4, %v1231_v3  ;;  %1227 = vst.msk [vmem:[#allocation3 + $0x10] sm:$0xff] %vm680_vm8, %v1211_v5  ;;  %v1235_v17 = vld [vmem:[#allocation3 + $0x6] sm:$0xff]  ;;  %1403 = vmatpush.msrb.mxu0 %v1341_v45  ;;  %1664 = vmatpush.msrb.mxu2 %v1350_v0  ;;  %v1335_v2 = vld [vmem:[%s2479_s5 + $0x88] sm:$0xff]  ;;  %v1334_v3 = vld [vmem:[%s2479_s5 + $0x80] sm:$0xff] }
 0x2af   : > { %v1174_v9 = vmul.f32 0.1, %v1169_v7  ;;  %v1233_v20 = vld [vmem:[#allocation3 + $0x5] sm:$0xff] }
 0x2b0   : > { %1738 = vrot.lane.b32.xlu1 %v1737_v8, %s1785_s15  ;;  %1404 = vmatpush.msrb.mxu0 %v1340_v48 }
 0x2b1   : > { %v1178_v11 = vmax.f32 %v1169_v7, %v1174_v9  ;;  %v1229_v9 = vld [vmem:[#allocation3 + $0x3] sm:$0xff] }
 0x2b2   : > { %1405 = vmatpush.msrb.mxu0 %v1339_v53 }
 0x2b3   : > { %1182 = vst.msk [vmem:[#allocation3 + $0x18] sm:$0xff] %vm680_vm8, %v1178_v11 }
 0x2b4   : > { %1228 = vst.msk [vmem:[#allocation3 + $0x18] sm:$0xff] %vm680_vm8, %v1789_v57  ;;  %1406 = vmatpush.msrb.mxu0 %v1338_v15 }
 0x2b5   : > { %v1236_v19 = vld [vmem:[#allocation3 + $0xe] sm:$0xff] }
 0x2b6   : > { %v1241_v21 = vld [vmem:[#allocation3 + $0x9] sm:$0xff]  ;;  %v1747_v22 = vpack.i.bf16 %v1236_v19, %v1235_v17  ;;  %1407 = vmatpush.msrb.mxu0 %v1337_v60 }
 0x2b7   : > { %v1742_v23 = vpack.i.bf16 %v1241_v21, %v1233_v20  ;;  %v1232_v25 = vld [vmem:[#allocation3 + $0xc] sm:$0xff] }
 0x2b8   : > { %1252 = vrot.lane.b32.xlu1 %v1232_v25, %s1785_s15  ;;  %1748 = vrot.lane.b32.xlu0 %v1747_v22, %s1790_s10  ;;  %v1243_v27 = vld [vmem:[#allocation3 + $0xa] sm:$0xff] }
 0x2b9   : > { %1743 = vrot.lane.b32.xlu2 %v1742_v23, %s1791_s11  ;;  %v1234_v28 = vld [vmem:[#allocation3 + $0xd] sm:$0xff]  ;;  %1408 = vmatpush.msrb.mxu0 %v1336_v1 }
 0x2ba   : > { %v1240_v31 = vld [vmem:[#allocation3 + $0x10] sm:$0xff]  ;;  %v1237_v21 = vld [vmem:[#allocation3 + $0x7] sm:$0xff] }
 0x2bb   : > { %v1246_v57 = vld [vmem:[#allocation3 + $0x14] sm:$0xff]  ;;  %1409 = vmatpush.msrb.mxu0 %v1335_v2  ;;  %v1230_v10 = vld [vmem:[#allocation3 + $0xb] sm:$0xff] }
 0x2bc   : > { %v1242_v29 = vld [vmem:[#allocation3 + $0x11] sm:$0xff] }
 0x2bd   : > { %v1247_v30 = vld [vmem:[#allocation3 + $0x15] sm:$0xff]  ;;  %1410 = vmatpush.msrb.mxu0 %v1334_v3 }
 0x2be   : > { %v1244_v32 = vld [vmem:[#allocation3 + $0x12] sm:$0xff] }
 0x2bf   : > { %v1245_v26 = vld [vmem:[#allocation3 + $0x13] sm:$0xff] }
 0x2c0   : > { %1297 = vrot.lane.b32.xlu1 %v1246_v57, %s1785_s15  ;;  %1290 = vrot.lane.b32.xlu0 %v1243_v27, %s1790_s10  ;;  %v1238_v34 = vld [vmem:[#allocation3 + $0xf] sm:$0xff] }
 0x2c1   : > { %1260 = vrot.lane.b32.xlu2 %v1234_v28, %s1791_s11 }
 0x2c8   : > { %1284 = vrot.lane.b32.xlu1 %v1242_v29, %s1791_s11  ;;  %1276 = vrot.lane.b32.xlu0 %v1240_v31, %s1785_s15 }
 0x2c9   : > { %1301 = vrot.lane.b32.xlu2 %v1247_v30, %s1791_s11 }
 0x2d1   : > { %1292 = vrot.lane.b32.xlu2 %v1244_v32, %s1790_s10 }
 0x313   : > { %v1744_v4 = vpop.permute.xlu2 %1743 }
 0x314   : > { %v1745_v12 = vunpack.i.l.bf16 %v1744_v4  ;;  %v1746_v23 = vunpack.i.h.bf16 %v1744_v4 }
 0x31b   : > { %v1261_v8 = vpop.permute.xlu2 %1260 }
 0x322   : > { %v1739_v5 = vpop.permute.xlu1 %1738 }
 0x323   : > { %v1740_v7 = vunpack.i.l.bf16 %v1739_v5  ;;  %v1741_v16 = vunpack.i.h.bf16 %v1739_v5  ;;  %v1302_v27 = vpop.permute.xlu2 %1301 }
 0x325   : > { %v1304_v11 = vsel %vm680_vm8, %v1229_v9, %v1740_v7  ;;  %v1310_v22 = vsel %vm680_vm8, %v1237_v21, %v1741_v16 }
 0x326   : > { %v1306_v19 = vsel %vm1000_vm12, %v1304_v11, %v1745_v12  ;;  %v1312_v31 = vsel %vm1000_vm12, %v1310_v22, %v1746_v23 }
 0x32a   : > { %v1253_v24 = vpop.permute.xlu1 %1252  ;;  %v1749_v13 = vpop.permute.xlu0 %1748 }
 0x32b   : > { %v1305_v14 = vsel %vm680_vm8, %v1230_v10, %v1253_v24  ;;  %v1750_v17 = vunpack.i.l.bf16 %v1749_v13  ;;  %v1751_v25 = vunpack.i.h.bf16 %v1749_v13  ;;  %v1293_v37 = vpop.permute.xlu2 %1292 }
 0x32c   : > { %v1307_v18 = vsel %vm1000_vm12, %v1305_v14, %v1261_v8 }
 0x32d   : > { %1647 = vmatmul.msk.f32.vlgmr.msrb.gmra.mxu1 %vm1005_vm13, %v1307_v18  ;;  %v1308_v20 = vsel %vm1005_vm13, %v1306_v19, %v1750_v17  ;;  %v1309_v33 = vsel %vm1005_vm13, %v1307_v18, %v1751_v25 }
 0x32e   : > { %1388 = vmatmul.f32.vlgmr.msrb.gmra.mxu3 %v1308_v20 }
 0x332   : > { %v1298_v57 = vpop.permute.xlu1 %1297  ;;  %v1291_v28 = vpop.permute.xlu0 %1290 }
 0x333   : > { %v1316_v29 = vsel %vm680_vm8, %v1245_v26, %v1298_v57  ;;  %v1314_v30 = vsel %vm1005_vm13, %v1312_v31, %v1291_v28 }
 0x334   : > { %v1317_v32 = vsel %vm1000_vm12, %v1316_v29, %v1302_v27  ;;  %1411 = vmatmul.f32.vlgmr.msrb.gmra.mxu0 %v1314_v30 }
 0x335   : > { %1648 = vmatmul.msk.f32.vlgmr.msrb.gmra.mxu2 %vm1005_vm13, %v1317_v32 }
 0x336   : > { %1391 = vmatmul.f32.gmra.mxu3 %v1309_v33 }
 0x33a   : > { %v1285_v6 = vpop.permute.xlu1 %1284  ;;  %v1277_v35 = vpop.permute.xlu0 %1276 }
 0x33b   : > { %v1311_v36 = vsel %vm680_vm8, %v1238_v34, %v1277_v35 }
 0x33c   : > { %v1313_v38 = vsel %vm1000_vm12, %v1311_v36, %v1285_v6 }
 0x33d   : > { %v1315_v39 = vsel %vm1005_vm13, %v1313_v38, %v1293_v37 }
 0x33e   : > { %1414 = vmatmul.f32.gmra.mxu0 %v1315_v39 }
 0x3aa   : > { %v1435_v45 = vpop.f32.mrf.mxu1 }
 0x3b1   : > { %v1389_v41 = vpop.f32.mrf.mxu3  ;;  %v1412_v43 = vpop.f32.mrf.mxu0 }
 0x3b2   : > { %v1390_v42 = vadd.f32 %v1754_v40, %v1389_v41 }
 0x3b4   : > { %v1413_v44 = vadd.f32 %v1412_v43, %v1390_v42 }
 0x3b6   : > { %v1436_v52 = vadd.f32 %v1435_v45, %v1413_v44 }
 0x3b8   : > { %v1441_v47 = vmul.f32 0.1, %v1436_v52  ;;  %v1438_v53 = vpop.f32.mrf.mxu2 }
 0x3b9   : > { %v1392_v48 = vpop.f32.mrf.mxu3 }
 0x3ba   : > { %v1443_v49 = vmax.f32 %v1436_v52, %v1441_v47  ;;  %v1393_v46 = vadd.f32 %v1754_v40, %v1392_v48 }
 0x3bb   : > { %v1415_v50 = vpop.f32.mrf.mxu0 }
 0x3bc   : > { %1445 = vst.msk [vmem:[%s300_s20] sm:$0xff] %vm638_vm2, %v1443_v49  ;;  %v1416_v51 = vadd.f32 %v1415_v50, %v1393_v46 }
 0x3be   : > { %v1439_v54 = vadd.f32 %v1438_v53, %v1416_v51 }
 0x3c0   : > { %v1442_v55 = vmul.f32 0.1, %v1439_v54 }
 0x3c2   : > { %v1444_v56 = vmax.f32 %v1439_v54, %v1442_v55 }
 0x3c4   : > { %1446 = vst.msk [vmem:[%s300_s20 + $0x8] sm:$0xff] %vm638_vm2, %v1444_v56 }
 0x3c5 PF: > { %s17_s26 = sadd.s32 1, %s1777_s26   ;;  %s2482_s24 = smov %s1773_s25 }
 0x3c6   : > { %p14_p5 = scmp.ge.s32.totalorder %s17_s26, 4   ;;  %s2483_s25 = smov %s2485_s27 }
 0x3c8   :  { %16 = sbr.rel (!%p14_p5) target bundleno = 2 (0x2), region = 97 }

</bundles_post_ra>
